<compile_context>
chip_gen: v7x
topology: tpu7x:2x2x1
jax: 0.10.0
libtpu: 0.0.40
codegen_flags: <defaults>
</compile_context>

<pallas_src>
import functools

import numpy as np
import jax
import jax.numpy as jnp
from jax import lax
from jax.experimental import pallas as pl
from jax.experimental.pallas import tpu as pltpu

MIN_SCALE = 0.3
MAX_SCALE = 1.0
MIN_AR = 0.5
MAX_AR = 2.0
OPTIONS = (0.0, 0.1, 0.3, 0.5, 0.7, 0.9, 1.0)
TRIALS = 40
NP = 128  # padded box count (lane width)


# --------------------------------------------------------------------------
# Kernel 1: evaluate all crop trials at once (VPU/EUP only).
# --------------------------------------------------------------------------
def _trial_kernel(params_ref, boxes_ref, bvalid_ref, miniou_ref,
                  keep_ref, adj_ref, meta_ref):
    p = params_ref[...]                        # (TRIALS, 8) f32
    left, top = p[:, 0:1], p[:, 1:2]
    right, bottom = p[:, 2:3], p[:, 3:4]
    new_w, new_h = p[:, 4:5], p[:, 5:6]
    base_ok = p[:, 6:7] > 0.5                  # (T, 1)

    x0 = boxes_ref[0:1, :]
    y0 = boxes_ref[1:2, :]
    x1 = boxes_ref[2:3, :]
    y1 = boxes_ref[3:4, :]
    bval = bvalid_ref[0:1, :] > 0.5            # (1, NP)

    cx = 0.5 * (x0 + x1)
    cy = 0.5 * (y0 + y1)
    # box center strictly inside the crop (per trial, per box)
    within = (left < cx) & (cx < right) & (top < cy) & (cy < bottom) & bval
    within_f = within.astype(jnp.float32)      # (T, NP)

    # torchvision box_iou(boxes, crop_box)
    iw = jnp.maximum(jnp.minimum(x1, right) - jnp.maximum(x0, left), 0.0)
    ih = jnp.maximum(jnp.minimum(y1, bottom) - jnp.maximum(y0, top), 0.0)
    inter = iw * ih
    area_b = (x1 - x0) * (y1 - y0)
    area_c = (right - left) * (bottom - top)
    union = area_b + area_c - inter
    # divide on the EUP; clamp denominator first so no 0/0 is ever formed
    iou = inter * pl.reciprocal(jnp.maximum(union, 1e-12), approx=True)
    iou = jnp.where(union > 0.0, iou, 0.0)     # (T, NP)

    iou_m = jnp.where(within, iou, -1.0)
    max_iou = jnp.max(iou_m, axis=1, keepdims=True)            # (T, 1)
    any_within = jnp.max(within_f, axis=1, keepdims=True) > 0.5

    thresh = miniou_ref[0]
    trial_ok = base_ok & any_within & (max_iou >= thresh)      # (T, 1)

    t_n = p.shape[0]
    tidx = lax.broadcasted_iota(jnp.int32, (t_n, 1), 0)
    cand = jnp.where(trial_ok, tidx, t_n)
    sel = jnp.min(cand, axis=0, keepdims=True)                 # (1, 1)
    found = sel < t_n
    onehot = ((tidx == sel) & found).astype(jnp.float32)       # (T, 1)

    sel_left = jnp.sum(onehot * left, axis=0, keepdims=True)   # (1, 1)
    sel_top = jnp.sum(onehot * top, axis=0, keepdims=True)
    sel_w = jnp.sum(onehot * new_w, axis=0, keepdims=True)
    sel_h = jnp.sum(onehot * new_h, axis=0, keepdims=True)

    # keep mask for the selected trial
    keep_ref[...] = jnp.sum(onehot * within_f, axis=0, keepdims=True)

    n_lanes = x0.shape[1]
    # shift by (left, top) and clamp to [0, new_w] x [0, new_h]
    adj_ref[0:1, :] = jnp.clip(x0 - sel_left, 0.0, sel_w)
    adj_ref[1:2, :] = jnp.clip(y0 - sel_top, 0.0, sel_h)
    adj_ref[2:3, :] = jnp.clip(x1 - sel_left, 0.0, sel_w)
    adj_ref[3:4, :] = jnp.clip(y1 - sel_top, 0.0, sel_h)
    adj_ref[4:8, :] = jnp.zeros((4, n_lanes), jnp.float32)

    # meta rows: [found, left, top, new_w, new_h, 0, 0, 0] broadcast over lanes
    meta_ref[0:1, :] = jnp.broadcast_to(found.astype(jnp.float32), (1, n_lanes))
    meta_ref[1:2, :] = jnp.broadcast_to(sel_left, (1, n_lanes))
    meta_ref[2:3, :] = jnp.broadcast_to(sel_top, (1, n_lanes))
    meta_ref[3:4, :] = jnp.broadcast_to(sel_w, (1, n_lanes))
    meta_ref[4:5, :] = jnp.broadcast_to(sel_h, (1, n_lanes))
    meta_ref[5:8, :] = jnp.zeros((3, n_lanes), jnp.float32)


def _run_trials(params, boxes_t, box_valid, min_iou_arr):
    vmem = pltpu.MemorySpace.VMEM
    smem = pltpu.MemorySpace.SMEM
    return pl.pallas_call(
        _trial_kernel,
        out_shape=(jax.ShapeDtypeStruct((1, NP), jnp.float32),   # keep
                   jax.ShapeDtypeStruct((8, NP), jnp.float32),   # adj boxes
                   jax.ShapeDtypeStruct((8, NP), jnp.float32)),  # meta
        in_specs=[pl.BlockSpec(memory_space=vmem),
                  pl.BlockSpec(memory_space=vmem),
                  pl.BlockSpec(memory_space=vmem),
                  pl.BlockSpec(memory_space=smem)],
        out_specs=(pl.BlockSpec(memory_space=vmem),
                   pl.BlockSpec(memory_space=vmem),
                   pl.BlockSpec(memory_space=vmem)),
    )(params, boxes_t, box_valid, min_iou_arr)


# --------------------------------------------------------------------------
# Kernel 2: crop as a scalar-prefetch-driven, block-offset DMA copy + mask.
#   sc = [r_off, c_off, nh, nw, top_blk, left_blk] (int32, SMEM prefetch)
#   input block for output tile (c,i,j) is (c, top_blk+i, left_blk+j), clamped
#   to stay in-bounds; the clamp only ever affects tiles that are fully masked.
#   Crop pixel (u, v) lands at output position (r_off+u, c_off+v); the final
#   host slice [r_off:r_off+nh, c_off:c_off+nw] extracts it.
# --------------------------------------------------------------------------
def _crop_kernel(sc_ref, img_ref, out_ref, *, bh, bw):
    i = pl.program_id(1)
    j = pl.program_id(2)
    r0 = sc_ref[0]
    c0 = sc_ref[1]
    nh = sc_ref[2]
    nw = sc_ref[3]
    rows = i * bh + lax.broadcasted_iota(jnp.int32, (bh, bw), 0)
    cols = j * bw + lax.broadcasted_iota(jnp.int32, (bh, bw), 1)
    mask = (rows >= r0) & (rows < r0 + nh) & (cols >= c0) & (cols < c0 + nw)
    out_ref[0] = jnp.where(mask, img_ref[0], 0.0)


def _run_crop(crop_sc, image, bh, bw):
    c_n, h, w = image.shape
    n_rb = pl.cdiv(h, bh)       # row blocks in the source image
    n_cb = pl.cdiv(w, bw)
    n_rt = n_rb + 1             # output tiles: cover r_off + nh <= (bh-1) + H
    n_ct = n_cb + 1
    max_rb = n_rb - 1
    max_cb = n_cb - 1

    def in_map(c, i, j, sc):
        # Block-granular dynamic offset from scalar prefetch; clamp keeps every
        # generated DMA in-bounds (clamped tiles contain no valid pixels).
        return (c,
                jnp.minimum(sc[4] + i, max_rb),
                jnp.minimum(sc[5] + j, max_cb))

    grid_spec = pltpu.PrefetchScalarGridSpec(
        num_scalar_prefetch=1,
        grid=(c_n, n_rt, n_ct),
        in_specs=[pl.BlockSpec((1, bh, bw), in_map)],
        out_specs=pl.BlockSpec((1, bh, bw), lambda c, i, j, sc: (c, i, j)),
    )
    return pl.pallas_call(
        functools.partial(_crop_kernel, bh=bh, bw=bw),
        out_shape=jax.ShapeDtypeStruct((c_n, n_rt * bh, n_ct * bw), jnp.float32),
        grid_spec=grid_spec,
        compiler_params=pltpu.CompilerParams(
            dimension_semantics=("parallel", "parallel", "parallel"),
            vmem_limit_bytes=32 * 1024 * 1024),
    )(crop_sc, image)


# --------------------------------------------------------------------------
# One fused device pipeline (single dispatch, no host syncs in the middle).
# --------------------------------------------------------------------------
@jax.jit
def _device_forward(image, boxes, key):
    c_n, h, w = image.shape
    n = boxes.shape[0]
    k_opt, k_scale, k_pos = jax.random.split(key, 3)

    min_iou = jnp.asarray(OPTIONS, jnp.float32)[
        jax.random.randint(k_opt, (), 0, len(OPTIONS))]

    # Per-trial crop proposals (mirrors the python int() math).
    r_scale = MIN_SCALE + (MAX_SCALE - MIN_SCALE) * jax.random.uniform(
        k_scale, (TRIALS, 2), jnp.float32)
    new_w = jnp.floor(w * r_scale[:, 0])
    new_h = jnp.floor(h * r_scale[:, 1])
    ar = new_w / jnp.maximum(new_h, 1.0)
    r_pos = jax.random.uniform(k_pos, (TRIALS, 2), jnp.float32)
    left = jnp.floor((w - new_w) * r_pos[:, 0])
    top = jnp.floor((h - new_h) * r_pos[:, 1])
    right = left + new_w
    bottom = top + new_h
    base_valid = ((MIN_AR <= ar) & (ar <= MAX_AR)
                  & (left != right) & (top != bottom))
    params = jnp.stack(
        [left, top, right, bottom, new_w, new_h,
         base_valid.astype(jnp.float32), jnp.zeros((TRIALS,), jnp.float32)],
        axis=1).astype(jnp.float32)

    boxes_t = jnp.zeros((8, NP), jnp.float32).at[:4, :n].set(boxes.T)
    box_valid = jnp.zeros((1, NP), jnp.float32).at[0, :n].set(1.0)

    keep, adj, meta = _run_trials(params, boxes_t, box_valid,
                                  jnp.reshape(min_iou, (1,)))

    # min_jaccard >= 1.0 -> module returns inputs unchanged (never "found").
    found = (meta[0, 0] > 0.5) & (min_iou < 1.0)
    top_i = jnp.where(found, meta[2, 0], 0.0).astype(jnp.int32)
    left_i = jnp.where(found, meta[1, 0], 0.0).astype(jnp.int32)
    nh_i = jnp.where(found, meta[4, 0], jnp.float32(h)).astype(jnp.int32)
    nw_i = jnp.where(found, meta[3, 0], jnp.float32(w)).astype(jnp.int32)

    bh, bw = min(64, h), min(128, w)
    top_blk, r_off = top_i // bh, top_i % bh
    left_blk, c_off = left_i // bw, left_i % bw
    crop_sc = jnp.stack(
        [r_off, c_off, nh_i, nw_i, top_blk, left_blk]).astype(jnp.int32)

    out_buf = _run_crop(crop_sc, image, bh, bw)
    return out_buf, keep, adj, found.astype(jnp.int32), crop_sc


def random_iou_crop(image, boxes, labels, key):
    """image: (C, H, W) f32, boxes: (N, 4) xyxy f32, labels: (N,) int32."""
    out_buf, keep, adj, found, crop_sc = _device_forward(image, boxes, key)
    jax.block_until_ready((out_buf, keep, adj, found, crop_sc))

    # Single host sync at the very end: dynamic output shapes (crop size and
    # kept-box count) can only be materialized on the host.
    out_np, keep_np, adj_np, found_np, sc_np, boxes_np, labels_np = (
        jax.device_get((out_buf, keep, adj, found, crop_sc, boxes, labels)))

    n = boxes_np.shape[0]
    r0, c0, nh, nw = (int(v) for v in sc_np[:4])
    cropped = out_np[:, r0:r0 + nh, c0:c0 + nw]

    if int(found_np):
        keep_mask = keep_np[0, :n] > 0.5
        out_boxes = adj_np[:4, :n].T[keep_mask]
        out_labels = labels_np[keep_mask]
    else:
        # TODO(synk): the PyTorch module loops forever resampling options/trials
        # when no trial succeeds; with a static schedule we return the inputs.
        out_boxes = boxes_np
        out_labels = labels_np
    return cropped, {"boxes": out_boxes, "labels": out_labels}


if __name__ == "__main__":
    key = jax.random.PRNGKey(0)
    kimg, kbox, kcall = jax.random.split(key, 3)

    C, H, W = 3, 256, 128          # H % 8 == 0, W % 128 == 0 (lane-dense)
    image = jax.random.uniform(kimg, (C, H, W), jnp.float32)

    N = 6
    wh_scale = jnp.array([W, H], jnp.float32)
    xy0 = jax.random.uniform(kbox, (N, 2), jnp.float32, 0.0, 0.6) * wh_scale
    wh = jax.random.uniform(jax.random.fold_in(kbox, 1), (N, 2), jnp.float32,
                            0.2, 0.4) * wh_scale
    boxes = jnp.concatenate(
        [xy0, jnp.minimum(xy0 + wh, wh_scale)], axis=1).astype(jnp.float32)
    labels = jnp.arange(1, N + 1, dtype=jnp.int32)

    out_img, out_tgt = random_iou_crop(image, boxes, labels, kcall)
    jax.block_until_ready(jnp.asarray(out_img))
    assert out_img.ndim == 3 and out_img.shape[0] == C
    assert out_tgt["boxes"].shape[0] == out_tgt["labels"].shape[0]
    print("KERNEL_OK")
</pallas_src>

<mosaic_0001>
module attributes {stable_mosaic.version = 11 : i64} {
  func.func @_crop_kernel(%arg0: i32, %arg1: i32, %arg2: i32, %arg3: memref<6xi32, #tpu.memory_space<smem>>, %arg4: memref<1x64x128xf32, #tpu.memory_space<vmem>>, %arg5: memref<1x64x128xf32, #tpu.memory_space<vmem>>) attributes {dimension_semantics = [#tpu.dimension_semantics<parallel>, #tpu.dimension_semantics<parallel>, #tpu.dimension_semantics<parallel>], iteration_bounds = array<i64: 3, 5, 2>, scalar_prefetch = 1 : i64, scratch_operands = 0 : i64, tpu.core_type = #tpu.core_type<tc>, window_params = [{transform_indices = @transform_0, window_bounds = array<i64: 1, 64, 128>}, {transform_indices = @transform_1, window_bounds = array<i64: 1, 64, 128>}]} {
    %c0 = arith.constant 0 : index
    %0 = memref.load %arg3[%c0] : memref<6xi32, #tpu.memory_space<smem>>
    %c1 = arith.constant 1 : index
    %1 = memref.load %arg3[%c1] : memref<6xi32, #tpu.memory_space<smem>>
    %c2 = arith.constant 2 : index
    %2 = memref.load %arg3[%c2] : memref<6xi32, #tpu.memory_space<smem>>
    %c3 = arith.constant 3 : index
    %3 = memref.load %arg3[%c3] : memref<6xi32, #tpu.memory_space<smem>>
    %c64_i32 = arith.constant 64 : i32
    %4 = arith.muli %arg1, %c64_i32 : i32
    %5 = tpu.iota {dimensions = array<i32: 0>} : vector<64x128xi32>
    %6 = vector.broadcast %4 : i32 to vector<64x128xi32>
    %7 = arith.addi %6, %5 : vector<64x128xi32>
    %c128_i32 = arith.constant 128 : i32
    %8 = arith.muli %arg2, %c128_i32 : i32
    %9 = tpu.iota {dimensions = array<i32: 1>} : vector<64x128xi32>
    %10 = vector.broadcast %8 : i32 to vector<64x128xi32>
    %11 = arith.addi %10, %9 : vector<64x128xi32>
    %12 = vector.broadcast %0 : i32 to vector<64x128xi32>
    %13 = arith.cmpi sge, %7, %12 : vector<64x128xi32>
    %14 = arith.addi %0, %2 : i32
    %15 = vector.broadcast %14 : i32 to vector<64x128xi32>
    %16 = arith.cmpi slt, %7, %15 : vector<64x128xi32>
    %17 = arith.andi %13, %16 : vector<64x128xi1>
    %18 = vector.broadcast %1 : i32 to vector<64x128xi32>
    %19 = arith.cmpi sge, %11, %18 : vector<64x128xi32>
    %20 = arith.andi %17, %19 : vector<64x128xi1>
    %21 = arith.addi %1, %3 : i32
    %22 = vector.broadcast %21 : i32 to vector<64x128xi32>
    %23 = arith.cmpi slt, %11, %22 : vector<64x128xi32>
    %24 = arith.andi %20, %23 : vector<64x128xi1>
    %c0_0 = arith.constant 0 : index
    %c0_1 = arith.constant 0 : index
    %c0_2 = arith.constant 0 : index
    %25 = vector.load %arg4[%c0_0, %c0_1, %c0_2] : memref<1x64x128xf32, #tpu.memory_space<vmem>>, vector<1x64x128xf32>
    %26 = vector.shape_cast %25 : vector<1x64x128xf32> to vector<64x128xf32>
    %cst = arith.constant 0.000000e+00 : f32
    %27 = vector.broadcast %cst : f32 to vector<64x128xf32>
    %28 = arith.select %24, %26, %27 : vector<64x128xi1>, vector<64x128xf32>
    %c0_3 = arith.constant 0 : index
    %c0_4 = arith.constant 0 : index
    %c0_5 = arith.constant 0 : index
    %29 = vector.load %arg5[%c0_3, %c0_4, %c0_5] : memref<1x64x128xf32, #tpu.memory_space<vmem>>, vector<1x64x128xf32>
    %30 = vector.shape_cast %29 : vector<1x64x128xf32> to vector<64x128xf32>
    %31 = vector.shape_cast %28 : vector<64x128xf32> to vector<1x64x128xf32>
    tpu.vector_store %arg5[%c0_3, %c0_4, %c0_5], %31 {strides = array<i32>} : memref<1x64x128xf32, #tpu.memory_space<vmem>>, vector<1x64x128xf32>,
    return
  }
  func.func @transform_0(%arg0: i32, %arg1: i32, %arg2: i32, %arg3: memref<6xi32, #tpu.memory_space<smem>>) -> (i32, i32, i32) {
    %c4 = arith.constant 4 : index
    %0 = memref.load %arg3[%c4] : memref<6xi32, #tpu.memory_space<smem>>
    %1 = arith.addi %0, %arg1 : i32
    %c3_i32 = arith.constant 3 : i32
    %2 = arith.minsi %1, %c3_i32 : i32
    %c5 = arith.constant 5 : index
    %3 = memref.load %arg3[%c5] : memref<6xi32, #tpu.memory_space<smem>>
    %4 = arith.addi %3, %arg2 : i32
    %c0_i32 = arith.constant 0 : i32
    %5 = arith.minsi %4, %c0_i32 : i32
    %c0_i32_0 = arith.constant 0 : i32
    return %arg0, %2, %5 : i32, i32, i32
  }
  func.func @transform_1(%arg0: i32, %arg1: i32, %arg2: i32, %arg3: memref<6xi32, #tpu.memory_space<smem>>) -> (i32, i32, i32) {
    %c0_i32 = arith.constant 0 : i32
    return %arg0, %arg1, %arg2 : i32, i32, i32
  }
}

module attributes {stable_mosaic.version = 11 : i64} {
  func.func @_trial_kernel(%arg0: memref<40x8xf32, #tpu.memory_space<vmem>>, %arg1: memref<8x128xf32, #tpu.memory_space<vmem>>, %arg2: memref<1x128xf32, #tpu.memory_space<vmem>>, %arg3: memref<1xf32, #tpu.memory_space<smem>>, %arg4: memref<1x128xf32, #tpu.memory_space<vmem>>, %arg5: memref<8x128xf32, #tpu.memory_space<vmem>>, %arg6: memref<8x128xf32, #tpu.memory_space<vmem>>) attributes {dimension_semantics = [], scalar_prefetch = 0 : i64, scratch_operands = 0 : i64, tpu.core_type = #tpu.core_type<tc>} {
    %c0 = arith.constant 0 : index
    %c0_0 = arith.constant 0 : index
    %0 = vector.load %arg0[%c0, %c0_0] : memref<40x8xf32, #tpu.memory_space<vmem>>, vector<40x8xf32>
    %1 = vector.extract_strided_slice %0 {offsets = [0, 0], sizes = [40, 1], strides = [1, 1]} : vector<40x8xf32> to vector<40x1xf32>
    %2 = vector.extract_strided_slice %0 {offsets = [0, 1], sizes = [40, 1], strides = [1, 1]} : vector<40x8xf32> to vector<40x1xf32>
    %3 = vector.extract_strided_slice %0 {offsets = [0, 2], sizes = [40, 1], strides = [1, 1]} : vector<40x8xf32> to vector<40x1xf32>
    %4 = vector.extract_strided_slice %0 {offsets = [0, 3], sizes = [40, 1], strides = [1, 1]} : vector<40x8xf32> to vector<40x1xf32>
    %5 = vector.extract_strided_slice %0 {offsets = [0, 4], sizes = [40, 1], strides = [1, 1]} : vector<40x8xf32> to vector<40x1xf32>
    %6 = vector.extract_strided_slice %0 {offsets = [0, 5], sizes = [40, 1], strides = [1, 1]} : vector<40x8xf32> to vector<40x1xf32>
    %7 = vector.extract_strided_slice %0 {offsets = [0, 6], sizes = [40, 1], strides = [1, 1]} : vector<40x8xf32> to vector<40x1xf32>
    %cst = arith.constant 5.000000e-01 : f32
    %8 = vector.broadcast %cst : f32 to vector<40x1xf32>
    %9 = arith.cmpf ogt, %7, %8 : vector<40x1xf32>
    %c0_1 = arith.constant 0 : index
    %c0_2 = arith.constant 0 : index
    %10 = vector.load %arg1[%c0_1, %c0_2] : memref<8x128xf32, #tpu.memory_space<vmem>>, vector<1x128xf32>
    %c1 = arith.constant 1 : index
    %c0_3 = arith.constant 0 : index
    %11 = vector.load %arg1[%c1, %c0_3] : memref<8x128xf32, #tpu.memory_space<vmem>>, vector<1x128xf32>
    %c2 = arith.constant 2 : index
    %c0_4 = arith.constant 0 : index
    %12 = vector.load %arg1[%c2, %c0_4] : memref<8x128xf32, #tpu.memory_space<vmem>>, vector<1x128xf32>
    %c3 = arith.constant 3 : index
    %c0_5 = arith.constant 0 : index
    %13 = vector.load %arg1[%c3, %c0_5] : memref<8x128xf32, #tpu.memory_space<vmem>>, vector<1x128xf32>
    %c0_6 = arith.constant 0 : index
    %c0_7 = arith.constant 0 : index
    %14 = vector.load %arg2[%c0_6, %c0_7] : memref<1x128xf32, #tpu.memory_space<vmem>>, vector<1x128xf32>
    %cst_8 = arith.constant 5.000000e-01 : f32
    %15 = vector.broadcast %cst_8 : f32 to vector<1x128xf32>
    %16 = arith.cmpf ogt, %14, %15 : vector<1x128xf32>
    %17 = arith.addf %10, %12 : vector<1x128xf32>
    %cst_9 = arith.constant 5.000000e-01 : f32
    %18 = vector.broadcast %cst_9 : f32 to vector<1x128xf32>
    %19 = arith.mulf %18, %17 : vector<1x128xf32>
    %20 = arith.addf %11, %13 : vector<1x128xf32>
    %cst_10 = arith.constant 5.000000e-01 : f32
    %21 = vector.broadcast %cst_10 : f32 to vector<1x128xf32>
    %22 = arith.mulf %21, %20 : vector<1x128xf32>
    %23 = vector.broadcast %1 : vector<40x1xf32> to vector<40x128xf32>
    %24 = vector.broadcast %19 : vector<1x128xf32> to vector<40x128xf32>
    %25 = arith.cmpf olt, %23, %24 : vector<40x128xf32>
    %26 = vector.broadcast %19 : vector<1x128xf32> to vector<40x128xf32>
    %27 = vector.broadcast %3 : vector<40x1xf32> to vector<40x128xf32>
    %28 = arith.cmpf olt, %26, %27 : vector<40x128xf32>
    %29 = arith.andi %25, %28 : vector<40x128xi1>
    %30 = vector.broadcast %2 : vector<40x1xf32> to vector<40x128xf32>
    %31 = vector.broadcast %22 : vector<1x128xf32> to vector<40x128xf32>
    %32 = arith.cmpf olt, %30, %31 : vector<40x128xf32>
    %33 = arith.andi %29, %32 : vector<40x128xi1>
    %34 = vector.broadcast %22 : vector<1x128xf32> to vector<40x128xf32>
    %35 = vector.broadcast %4 : vector<40x1xf32> to vector<40x128xf32>
    %36 = arith.cmpf olt, %34, %35 : vector<40x128xf32>
    %37 = arith.andi %33, %36 : vector<40x128xi1>
    %38 = vector.broadcast %16 : vector<1x128xi1> to vector<40x128xi1>
    %39 = arith.andi %37, %38 : vector<40x128xi1>
    %40 = arith.extui %39 : vector<40x128xi1> to vector<40x128xi32>
    %41 = arith.sitofp %40 : vector<40x128xi32> to vector<40x128xf32>
    %42 = vector.broadcast %12 : vector<1x128xf32> to vector<40x128xf32>
    %43 = vector.broadcast %3 : vector<40x1xf32> to vector<40x128xf32>
    %44 = arith.minimumf %42, %43 : vector<40x128xf32>
    %45 = vector.broadcast %10 : vector<1x128xf32> to vector<40x128xf32>
    %46 = vector.broadcast %1 : vector<40x1xf32> to vector<40x128xf32>
    %47 = arith.maximumf %45, %46 : vector<40x128xf32>
    %48 = arith.subf %44, %47 : vector<40x128xf32>
    %cst_11 = arith.constant 0.000000e+00 : f32
    %49 = vector.broadcast %cst_11 : f32 to vector<40x128xf32>
    %50 = arith.maximumf %48, %49 : vector<40x128xf32>
    %51 = vector.broadcast %13 : vector<1x128xf32> to vector<40x128xf32>
    %52 = vector.broadcast %4 : vector<40x1xf32> to vector<40x128xf32>
    %53 = arith.minimumf %51, %52 : vector<40x128xf32>
    %54 = vector.broadcast %11 : vector<1x128xf32> to vector<40x128xf32>
    %55 = vector.broadcast %2 : vector<40x1xf32> to vector<40x128xf32>
    %56 = arith.maximumf %54, %55 : vector<40x128xf32>
    %57 = arith.subf %53, %56 : vector<40x128xf32>
    %cst_12 = arith.constant 0.000000e+00 : f32
    %58 = vector.broadcast %cst_12 : f32 to vector<40x128xf32>
    %59 = arith.maximumf %57, %58 : vector<40x128xf32>
    %60 = arith.mulf %50, %59 : vector<40x128xf32>
    %61 = arith.subf %12, %10 : vector<1x128xf32>
    %62 = arith.subf %13, %11 : vector<1x128xf32>
    %63 = arith.mulf %61, %62 : vector<1x128xf32>
    %64 = arith.subf %3, %1 : vector<40x1xf32>
    %65 = arith.subf %4, %2 : vector<40x1xf32>
    %66 = arith.mulf %64, %65 : vector<40x1xf32>
    %67 = vector.broadcast %63 : vector<1x128xf32> to vector<40x128xf32>
    %68 = vector.broadcast %66 : vector<40x1xf32> to vector<40x128xf32>
    %69 = arith.addf %67, %68 : vector<40x128xf32>
    %70 = arith.subf %69, %60 : vector<40x128xf32>
    %cst_13 = arith.constant 9.99999996E-13 : f32
    %71 = vector.broadcast %cst_13 : f32 to vector<40x128xf32>
    %72 = arith.maximumf %70, %71 : vector<40x128xf32>
    %73 = tpu.reciprocal %72 {approx = true} : vector<40x128xf32> -> vector<40x128xf32>
    %74 = arith.mulf %60, %73 : vector<40x128xf32>
    %cst_14 = arith.constant 0.000000e+00 : f32
    %75 = vector.broadcast %cst_14 : f32 to vector<40x128xf32>
    %76 = arith.cmpf ogt, %70, %75 : vector<40x128xf32>
    %cst_15 = arith.constant 0.000000e+00 : f32
    %77 = vector.broadcast %cst_15 : f32 to vector<40x128xf32>
    %78 = arith.select %76, %74, %77 : vector<40x128xi1>, vector<40x128xf32>
    %cst_16 = arith.constant -1.000000e+00 : f32
    %79 = vector.broadcast %cst_16 : f32 to vector<40x128xf32>
    %80 = arith.select %39, %78, %79 : vector<40x128xi1>, vector<40x128xf32>
    %cst_17 = arith.constant dense<0xFF800000> : vector<40xf32>
    %81 = vector.multi_reduction <maximumf>, %80, %cst_17 [1] : vector<40x128xf32> to vector<40xf32>
    %82 = vector.shape_cast %81 : vector<40xf32> to vector<40x1xf32>
    %cst_18 = arith.constant dense<0xFF800000> : vector<40xf32>
    %83 = vector.multi_reduction <maximumf>, %41, %cst_18 [1] : vector<40x128xf32> to vector<40xf32>
    %84 = vector.shape_cast %83 : vector<40xf32> to vector<40x1xf32>
    %cst_19 = arith.constant 5.000000e-01 : f32
    %85 = vector.broadcast %cst_19 : f32 to vector<40x1xf32>
    %86 = arith.cmpf ogt, %84, %85 : vector<40x1xf32>
    %c0_20 = arith.constant 0 : index
    %87 = memref.load %arg3[%c0_20] : memref<1xf32, #tpu.memory_space<smem>>
    %88 = arith.andi %9, %86 : vector<40x1xi1>
    %89 = vector.broadcast %87 : f32 to vector<40x1xf32>
    %90 = arith.cmpf oge, %82, %89 : vector<40x1xf32>
    %91 = arith.andi %88, %90 : vector<40x1xi1>
    %92 = tpu.iota {dimensions = array<i32: 0>} : vector<40x1xi32>
    %c40_i32 = arith.constant 40 : i32
    %93 = vector.broadcast %c40_i32 : i32 to vector<40x1xi32>
    %94 = arith.select %91, %92, %93 : vector<40x1xi1>, vector<40x1xi32>
    %cst_21 = arith.constant dense<2147483647> : vector<1xi32>
    %95 = vector.multi_reduction <minsi>, %94, %cst_21 [0] : vector<40x1xi32> to vector<1xi32>
    %96 = vector.shape_cast %95 : vector<1xi32> to vector<1x1xi32>
    %c40_i32_22 = arith.constant 40 : i32
    %97 = vector.broadcast %c40_i32_22 : i32 to vector<1x1xi32>
    %98 = arith.cmpi slt, %96, %97 : vector<1x1xi32>
    %99 = vector.broadcast %96 : vector<1x1xi32> to vector<40x1xi32>
    %100 = arith.cmpi eq, %92, %99 : vector<40x1xi32>
    %101 = vector.broadcast %98 : vector<1x1xi1> to vector<40x1xi1>
    %102 = arith.andi %100, %101 : vector<40x1xi1>
    %103 = arith.extui %102 : vector<40x1xi1> to vector<40x1xi32>
    %104 = arith.sitofp %103 : vector<40x1xi32> to vector<40x1xf32>
    %105 = arith.mulf %104, %1 : vector<40x1xf32>
    %cst_23 = arith.constant dense<0.000000e+00> : vector<1xf32>
    %106 = vector.multi_reduction <add>, %105, %cst_23 [0] : vector<40x1xf32> to vector<1xf32>
    %107 = vector.shape_cast %106 : vector<1xf32> to vector<1x1xf32>
    %108 = arith.mulf %104, %2 : vector<40x1xf32>
    %cst_24 = arith.constant dense<0.000000e+00> : vector<1xf32>
    %109 = vector.multi_reduction <add>, %108, %cst_24 [0] : vector<40x1xf32> to vector<1xf32>
    %110 = vector.shape_cast %109 : vector<1xf32> to vector<1x1xf32>
    %111 = arith.mulf %104, %5 : vector<40x1xf32>
    %cst_25 = arith.constant dense<0.000000e+00> : vector<1xf32>
    %112 = vector.multi_reduction <add>, %111, %cst_25 [0] : vector<40x1xf32> to vector<1xf32>
    %113 = vector.shape_cast %112 : vector<1xf32> to vector<1x1xf32>
    %114 = arith.mulf %104, %6 : vector<40x1xf32>
    %cst_26 = arith.constant dense<0.000000e+00> : vector<1xf32>
    %115 = vector.multi_reduction <add>, %114, %cst_26 [0] : vector<40x1xf32> to vector<1xf32>
    %116 = vector.shape_cast %115 : vector<1xf32> to vector<1x1xf32>
    %117 = vector.broadcast %104 : vector<40x1xf32> to vector<40x128xf32>
    %118 = arith.mulf %117, %41 : vector<40x128xf32>
    %cst_27 = arith.constant dense<0.000000e+00> : vector<128xf32>
    %119 = vector.multi_reduction <add>, %118, %cst_27 [0] : vector<40x128xf32> to vector<128xf32>
    %120 = vector.shape_cast %119 : vector<128xf32> to vector<1x128xf32>
    %c0_28 = arith.constant 0 : index
    %c0_29 = arith.constant 0 : index
    %121 = vector.load %arg4[%c0_28, %c0_29] : memref<1x128xf32, #tpu.memory_space<vmem>>, vector<1x128xf32>
    tpu.vector_store %arg4[%c0_28, %c0_29], %120 {strides = array<i32>} : memref<1x128xf32, #tpu.memory_space<vmem>>, vector<1x128xf32>,
    %122 = vector.broadcast %107 : vector<1x1xf32> to vector<1x128xf32>
    %123 = arith.subf %10, %122 : vector<1x128xf32>
    %cst_30 = arith.constant 0.000000e+00 : f32
    %124 = vector.broadcast %cst_30 : f32 to vector<1x128xf32>
    %125 = arith.maximumf %124, %123 : vector<1x128xf32>
    %126 = vector.broadcast %113 : vector<1x1xf32> to vector<1x128xf32>
    %127 = arith.minimumf %126, %125 : vector<1x128xf32>
    %c0_31 = arith.constant 0 : index
    %c0_32 = arith.constant 0 : index
    %128 = vector.load %arg5[%c0_31, %c0_32] : memref<8x128xf32, #tpu.memory_space<vmem>>, vector<1x128xf32>
    tpu.vector_store %arg5[%c0_31, %c0_32], %127 {strides = array<i32>} : memref<8x128xf32, #tpu.memory_space<vmem>>, vector<1x128xf32>,
    %129 = vector.broadcast %110 : vector<1x1xf32> to vector<1x128xf32>
    %130 = arith.subf %11, %129 : vector<1x128xf32>
    %cst_33 = arith.constant 0.000000e+00 : f32
    %131 = vector.broadcast %cst_33 : f32 to vector<1x128xf32>
    %132 = arith.maximumf %131, %130 : vector<1x128xf32>
    %133 = vector.broadcast %116 : vector<1x1xf32> to vector<1x128xf32>
    %134 = arith.minimumf %133, %132 : vector<1x128xf32>
    %c1_34 = arith.constant 1 : index
    %c0_35 = arith.constant 0 : index
    %135 = vector.load %arg5[%c1_34, %c0_35] : memref<8x128xf32, #tpu.memory_space<vmem>>, vector<1x128xf32>
    tpu.vector_store %arg5[%c1_34, %c0_35], %134 {strides = array<i32>} : memref<8x128xf32, #tpu.memory_space<vmem>>, vector<1x128xf32>,
    %136 = vector.broadcast %107 : vector<1x1xf32> to vector<1x128xf32>
    %137 = arith.subf %12, %136 : vector<1x128xf32>
    %cst_36 = arith.constant 0.000000e+00 : f32
    %138 = vector.broadcast %cst_36 : f32 to vector<1x128xf32>
    %139 = arith.maximumf %138, %137 : vector<1x128xf32>
    %140 = vector.broadcast %113 : vector<1x1xf32> to vector<1x128xf32>
    %141 = arith.minimumf %140, %139 : vector<1x128xf32>
    %c2_37 = arith.constant 2 : index
    %c0_38 = arith.constant 0 : index
    %142 = vector.load %arg5[%c2_37, %c0_38] : memref<8x128xf32, #tpu.memory_space<vmem>>, vector<1x128xf32>
    tpu.vector_store %arg5[%c2_37, %c0_38], %141 {strides = array<i32>} : memref<8x128xf32, #tpu.memory_space<vmem>>, vector<1x128xf32>,
    %143 = vector.broadcast %110 : vector<1x1xf32> to vector<1x128xf32>
    %144 = arith.subf %13, %143 : vector<1x128xf32>
    %cst_39 = arith.constant 0.000000e+00 : f32
    %145 = vector.broadcast %cst_39 : f32 to vector<1x128xf32>
    %146 = arith.maximumf %145, %144 : vector<1x128xf32>
    %147 = vector.broadcast %116 : vector<1x1xf32> to vector<1x128xf32>
    %148 = arith.minimumf %147, %146 : vector<1x128xf32>
    %c3_40 = arith.constant 3 : index
    %c0_41 = arith.constant 0 : index
    %149 = vector.load %arg5[%c3_40, %c0_41] : memref<8x128xf32, #tpu.memory_space<vmem>>, vector<1x128xf32>
    tpu.vector_store %arg5[%c3_40, %c0_41], %148 {strides = array<i32>} : memref<8x128xf32, #tpu.memory_space<vmem>>, vector<1x128xf32>,
    %cst_42 = arith.constant 0.000000e+00 : f32
    %150 = vector.broadcast %cst_42 : f32 to vector<4x128xf32>
    %c4 = arith.constant 4 : index
    %c0_43 = arith.constant 0 : index
    %151 = vector.load %arg5[%c4, %c0_43] : memref<8x128xf32, #tpu.memory_space<vmem>>, vector<4x128xf32>
    tpu.vector_store %arg5[%c4, %c0_43], %150 {strides = array<i32>} : memref<8x128xf32, #tpu.memory_space<vmem>>, vector<4x128xf32>,
    %152 = arith.extui %98 : vector<1x1xi1> to vector<1x1xi32>
    %153 = arith.sitofp %152 : vector<1x1xi32> to vector<1x1xf32>
    %154 = vector.shape_cast %153 : vector<1x1xf32> to vector<1x1xf32>
    %155 = vector.broadcast %154 : vector<1x1xf32> to vector<1x128xf32>
    %c0_44 = arith.constant 0 : index
    %c0_45 = arith.constant 0 : index
    %156 = vector.load %arg6[%c0_44, %c0_45] : memref<8x128xf32, #tpu.memory_space<vmem>>, vector<1x128xf32>
    tpu.vector_store %arg6[%c0_44, %c0_45], %155 {strides = array<i32>} : memref<8x128xf32, #tpu.memory_space<vmem>>, vector<1x128xf32>,
    %157 = vector.shape_cast %107 : vector<1x1xf32> to vector<1x1xf32>
    %158 = vector.broadcast %157 : vector<1x1xf32> to vector<1x128xf32>
    %c1_46 = arith.constant 1 : index
    %c0_47 = arith.constant 0 : index
    %159 = vector.load %arg6[%c1_46, %c0_47] : memref<8x128xf32, #tpu.memory_space<vmem>>, vector<1x128xf32>
    tpu.vector_store %arg6[%c1_46, %c0_47], %158 {strides = array<i32>} : memref<8x128xf32, #tpu.memory_space<vmem>>, vector<1x128xf32>,
    %160 = vector.shape_cast %110 : vector<1x1xf32> to vector<1x1xf32>
    %161 = vector.broadcast %160 : vector<1x1xf32> to vector<1x128xf32>
    %c2_48 = arith.constant 2 : index
    %c0_49 = arith.constant 0 : index
    %162 = vector.load %arg6[%c2_48, %c0_49] : memref<8x128xf32, #tpu.memory_space<vmem>>, vector<1x128xf32>
    tpu.vector_store %arg6[%c2_48, %c0_49], %161 {strides = array<i32>} : memref<8x128xf32, #tpu.memory_space<vmem>>, vector<1x128xf32>,
    %163 = vector.shape_cast %113 : vector<1x1xf32> to vector<1x1xf32>
    %164 = vector.broadcast %163 : vector<1x1xf32> to vector<1x128xf32>
    %c3_50 = arith.constant 3 : index
    %c0_51 = arith.constant 0 : index
    %165 = vector.load %arg6[%c3_50, %c0_51] : memref<8x128xf32, #tpu.memory_space<vmem>>, vector<1x128xf32>
    tpu.vector_store %arg6[%c3_50, %c0_51], %164 {strides = array<i32>} : memref<8x128xf32, #tpu.memory_space<vmem>>, vector<1x128xf32>,
    %166 = vector.shape_cast %116 : vector<1x1xf32> to vector<1x1xf32>
    %167 = vector.broadcast %166 : vector<1x1xf32> to vector<1x128xf32>
    %c4_52 = arith.constant 4 : index
    %c0_53 = arith.constant 0 : index
    %168 = vector.load %arg6[%c4_52, %c0_53] : memref<8x128xf32, #tpu.memory_space<vmem>>, vector<1x128xf32>
    tpu.vector_store %arg6[%c4_52, %c0_53], %167 {strides = array<i32>} : memref<8x128xf32, #tpu.memory_space<vmem>>, vector<1x128xf32>,
    %cst_54 = arith.constant 0.000000e+00 : f32
    %169 = vector.broadcast %cst_54 : f32 to vector<3x128xf32>
    %c5 = arith.constant 5 : index
    %c0_55 = arith.constant 0 : index
    %170 = vector.load %arg6[%c5, %c0_55] : memref<8x128xf32, #tpu.memory_space<vmem>>, vector<3x128xf32>
    tpu.vector_store %arg6[%c5, %c0_55], %169 {strides = array<i32>} : memref<8x128xf32, #tpu.memory_space<vmem>>, vector<3x128xf32>,
    return
  }
}

</mosaic_0001>

<bundles_post_ra>
// kernel: _device_forward.5
= control target key start
LH: loop header
LB: loop body
LE: loop exit
PB: predicated region body
PF: predicated region fallthrough
CT: control target
= control target key end

     0   :  { %s1004_s0 = inlined_call_operand.vmem [shape: s32[6], index: 0, kind: input, shape index: {}]   ;;  %s1005_s1 = inlined_call_operand.vmem [shape: f32[3,256,128], index: 1, kind: input, shape index: {}]   ;;  %s1006_s2 = inlined_call_operand.hbm [shape: f32[3,320,256], index: 2, kind: output, shape index: {}]  }
   0x1   :  { %s7_s11 = sshll.u32 %s1004_s0, 4  ;;  %s8_s11 = int_to_ptr.vmem [resolvable:$true] %s7_s11 }
   0x2   :  { %s561_s12 = scalar_lea.vmem %s8_s11, 16  ;;  %p566_p1 = scmp.lt.s32.totalorder %s8_s11, %s8_s11 }
   0x3   :  { %p562_p0 = scmp.ne.s32.totalorder %s8_s11, %s561_s12  ;;  %p567_p2 = scmp.lt.s32.totalorder %s561_s12, %s561_s12 }
   0x5   :  { %p568_p3 = por %p567_p2, %p566_p1 }
   0x7   :  { %p569_p4 = pnand %p568_p3, %p562_p0 }
   0x9   :  { %572 = shalt.err (!%p569_p4)  }
   0xa   :  { %s687_s13 = smov [#allocation3]  }
   0xb   :  { %10 = dma.vmem_to_smem %s8_s11, 16, %s687_s13, [#allocation2] }
   0xc   :  { %641 = dma.done.wait [#allocation2], 16 }
   0xd   :  { %642 = vsyncadd [#allocation2], 4294967280 }
   0xe   :  { %12 = sfence }
   0xf   :  { %13 = vsyncpa [#allocation5], 0 }
  0x10   :  { %15 = vsyncpa [#allocation5 + $0x1], 0  ;;  %s710_s14 = smov 0   ;;  %s712_s15 = smov 0  }
  0x11   :  { %s714_s0 = smov 0   ;;  %s716_s16 = smov 0  }
  0x12   :  { %s718_s17 = smov 0   ;;  %s720_s18 = smov 0  }
  0x13   :  { %s722_s19 = smov 0   ;;  %s724_s20 = smov 0  }
  0x14   :  { %s726_s21 = smov 0   ;;  %s728_s22 = smov 0  }
  0x15 LB: > { %s439_s23 = sadd.s32 4294967295, %s685_s22   ;;  %s33_s24 = sadd.s32 1, %s673_s19  ;;  %s685_s22 = sphi %s728_s22, %s21_s22   ;;  %s681_s21 = sphi %s726_s21, %s1023_s21   ;;  %s677_s20 = sphi %s724_s20, %s1022_s20   ;;  %s673_s19 = sphi %s722_s19, %s1021_s19   ;;  %s669_s18 = sphi %s720_s18, %s1020_s18   ;;  %s665_s17 = sphi %s718_s17, %s1019_s17   ;;  %s661_s16 = sphi %s716_s16, %s1018_s16   ;;  %s657_s0 = sphi %s714_s0, %s1017_s0   ;;  %s653_s15 = sphi %s712_s15, %s1016_s15   ;;  %s649_s14 = sphi %s710_s14, %s1015_s14  }
  0x16   : > { %p34_p5 = scmp.ge.s32.totalorder %s33_s24, 2  ;;  %s36_s25 = sadd.s32 1, %s677_s20 }
  0x17   : > { %s440_s26 = sadd.s32 4294967294, %s685_s22   ;;  %p107_p6 = scmp.ne.s32.totalorder %s657_s0, %s653_s15 }
  0x18   : > { %s1025_s24 = smov (%p34_p5, %s33_s24), 0  ;;  %s1027_s25 = smov (!%p34_p5, %s36_s25), %s677_s20 }
  0x19   : > { %s40_s27 = sadd.s32 1, %s681_s21  ;;  %p108_p7 = scmp.eq.s32.totalorder %s439_s23, 29 }
  0x1a   : > { %p38_p8 = scmp.ge.s32.totalorder %s1027_s25, 5  ;;  %p113_p9 = scmp.ne.s32.totalorder %s653_s15, %s649_s14 }
  0x1b   : > { %p772_p10 = por %p108_p7, %p107_p6  ;;  %p114_p11 = scmp.eq.s32.totalorder %s440_s26, 29 }
  0x1c   : > { %s1029_s25 = smov (%p38_p8, %s1027_s25), 0  ;;  %s1031_s27 = smov (!%p38_p8, %s40_s27), %s681_s21 }
  0x1d   : > { %p779_p12 = por %p114_p11, %p113_p9  ;;  %p42_p13 = scmp.ge.s32.totalorder %s1031_s27, 3 }
  0x1e   : > { %p447_p0 = scmp.ge.s32.totalorder %s685_s22, 1  ;;  %s91_s30 = ssub.s32 %s677_s20, %s1029_s25 }
  0x1f   : > { %p164_p1 = scmp.lt.s32.totalorder %s685_s22, 31  ;;  %s1033_s27 = smov (%p42_p13, %s1031_s27), 0 }
  0x20   : > { %s93_s3 = ssub.s32 %s673_s19, %s1025_s24  ;;  %s90_s4 = ssub.s32 %s681_s21, %s1033_s27 }
  0x21   : > { %p165_p2 = pnand %p447_p0, %p164_p1  ;;  %s92_s5 = sor.u32 %s91_s30, %s90_s4 }
  0x22   : > { %s94_s6 = sor.u32 %s93_s3, %s92_s5  ;;  %s97_s7 = sadd.s32 1, %s657_s0  ;;  %v234_v0 = vlaneseq (!%p165_p2) }
  0x23   : > { %p95_p3 = scmp.eq.s32.totalorder %s94_s6, 0  ;;  %168 = sbr.rel (%p165_p2) target bundleno = 92 (0x5c), region = 24 }
  0x24   : > { %s449_s9 = sld [smem:[#allocation3 + $0x4]] (!%p165_p2)  ;;  %s450_s10 = sld [smem:[#allocation3 + $0x5]] (!%p165_p2)  ;;  %v799_v1 = vshrl.u32 (!%p165_p2), %v234_v0, 7  ;;  %v254_v4 = vand.u32 (!%p165_p2), 127, %v234_v0 }
  0x25   : > { %s795_s8 = scalar_select %p95_p3, %s657_s0, %s97_s7  }
  0x26   : > { %s196_s11 = sand.u32 (!%p165_p2), 1, %s653_s15   ;;  %p208_p4 = scmp.lt.s32.totalorder (!%p165_p2), %s669_s18, 2  ;;  %v236_v2 = vadd.s32 (!%p165_p2), 8, %v799_v1  ;;  %v237_v8 = vadd.s32 (!%p165_p2), 16, %v799_v1  ;;  %v238_v13 = vadd.s32 (!%p165_p2), 24, %v799_v1  ;;  %v239_v17 = vadd.s32 (!%p165_p2), 32, %v799_v1 }
  0x27   : > { %s801_s12 = sld [smem:[#allocation3]] (!%p165_p2)  ;;  %s803_s13 = sld [smem:[#allocation3 + $0x1]] (!%p165_p2)  ;;  %v240_v21 = vadd.s32 (!%p165_p2), 40, %v799_v1  ;;  %v241_v28 = vadd.s32 (!%p165_p2), 48, %v799_v1  ;;  %v242_v32 = vadd.s32 (!%p165_p2), 56, %v799_v1 }
  0x28   : > { %s458_s26 = sld [smem:[#allocation3 + $0x2]] (!%p165_p2)  ;;  %s808_s30 = sld [smem:[#allocation3 + $0x3]] (!%p165_p2) }
  0x29   : > { %s460_s6 = sshll.u32 (!%p165_p2), %s665_s17, 6 }
  0x2a   : > { %s806_s23 = scalar_select %p208_p4, %s669_s18, 2  ;;  %v815_v3 = vstv %s460_s6 }
  0x2b   : > { %s200_s3 = sadd.s32 %s665_s17, %s449_s9  ;;  %s204_s5 = sadd.s32 %s661_s16, %s450_s10  ;;  %v244_v6 = vadd.s32 %v815_v3, %v799_v1  ;;  %v245_v7 = vadd.s32 %v815_v3, %v236_v2  ;;  %v246_v14 = vadd.s32 %v815_v3, %v237_v8  ;;  %v247_v19 = vadd.s32 %v815_v3, %v238_v13 }
  0x2c   : > { %s455_s4 = sshll.u32 %s806_s23, 5  ;;  %p201_p5 = scmp.lt.s32.totalorder %s200_s3, 3  ;;  %v248_v24 = vadd.s32 %v815_v3, %v239_v17  ;;  %v249_v29 = vadd.s32 %v815_v3, %v240_v21  ;;  %v250_v33 = vadd.s32 %v815_v3, %v241_v28  ;;  %v251_v36 = vadd.s32 %v815_v3, %v242_v32 }
  0x2d   : > { %p205_p6 = scmp.lt.s32.totalorder %s204_s5, 0  ;;  %v818_v5 = vstv %s801_s12  ;;  %s461_s10 = sshll.u32 %s661_s16, 7  ;;  %v284_v10 = vstv %s803_s13 }
  0x2e   : > { %s1035_s3 = smov (!%p201_p5, %s200_s3), 3  ;;  %v255_v9 = vstv %s461_s10  ;;  %vm258_vm0 = vcmp.ge.s32.totalorder %v244_v6, %v818_v5  ;;  %s266_s6 = sadd.s32 %s458_s26, %s801_s12  ;;  %vm259_vm2 = vcmp.ge.s32.totalorder %v245_v7, %v818_v5  ;;  %vm260_vm10 = vcmp.ge.s32.totalorder %v246_v14, %v818_v5 }
  0x2f   : > { %s206_s7 = scalar_select %p205_p6, %s204_s5, 0  ;;  %v256_v11 = vadd.s32 %v255_v9, %v254_v4  ;;  %v830_v12 = vstv %s266_s6  ;;  %vm261_vm15 = vcmp.ge.s32.totalorder %v247_v19, %v818_v5 }
  0x30   : > { %s451_s9 = sshll.u32 %s1035_s3, 3  ;;  %vm268_vm1 = vcmp.lt.s32.totalorder %v244_v6, %v830_v12  ;;  %vm269_vm3 = vcmp.lt.s32.totalorder %v245_v7, %v830_v12  ;;  %s294_s12 = sadd.s32 %s808_s30, %s803_s13  ;;  %vm270_vm11 = vcmp.lt.s32.totalorder %v246_v14, %v830_v12 }
  0x31   : > { %p210_p7 = scmp.lt.s32.totalorder %s451_s9, 31  ;;  %s1037_s7 = smov (!%p205_p6, %s206_s7), 0  ;;  %vm276_vm4 = vmand %vm258_vm0, %vm268_vm1  ;;  %vm837_vm5 = vcmp.ge.s32.totalorder %v256_v11, %v284_v10  ;;  %v295_v16 = vstv %s294_s12  ;;  %vm271_vm0 = vcmp.lt.s32.totalorder %v247_v19, %v830_v12 }
  0x32   : > { %s448_s26 = sshll.u32 %s196_s11, 6  ;;  %vm286_vm6 = vmand %vm276_vm4, %vm837_vm5  ;;  %vm850_vm7 = vcmp.lt.s32.totalorder %v256_v11, %v295_v16  ;;  %vm262_vm4 = vcmp.ge.s32.totalorder %v248_v24, %v818_v5  ;;  %s688_s13 = smov [#allocation4]  }
  0x33   : > { %s1039_s9 = smov (!%p210_p7, %s451_s9), 31  ;;  %vm277_vm8 = vmand %vm259_vm2, %vm269_vm3  ;;  %s577_s23 = sshll.u32 %s688_s13, 4  ;;  %s578_s23 = int_to_ptr.vmem [resolvable:$false] %s577_s23 }
  0x34   : > { %s214_s3 = sadd.s32 %s1037_s7, %s1039_s9  ;;  %vm857_vm9 = vmand %vm286_vm6, %vm850_vm7  ;;  %vm272_vm6 = vcmp.lt.s32.totalorder %v248_v24, %v830_v12  ;;  %s468_s7 = sshll.u32 %s665_s17, 4 }
  0x35   : > { %s216_s5 = sadd.s32 %s455_s4, %s214_s3  ;;  %vm287_vm12 = vmand %vm277_vm8, %vm837_vm5  ;;  %s881_s4 = scalar_lea.vmem [#allocation4], %s448_s26 }
  0x36   : > { %s456_s10 = sshll.u32 %s216_s5, 3  ;;  %vm298_vm13 = vmand %vm287_vm12, %vm850_vm7  ;;  %vm273_vm12 = vcmp.lt.s32.totalorder %v249_v29, %v830_v12  ;;  %s469_s9 = smul.u32 80, %s669_s18 }
  0x37   : > { %s866_s30 = scalar_lea.vmem %s1005_s1, %s456_s10  ;;  %vm278_vm14 = vmand %vm260_vm10, %vm270_vm11  ;;  %vm263_vm11 = vcmp.ge.s32.totalorder %v249_v29, %v818_v5  ;;  %s342_s17 = sadd.s32 %s661_s16, %s468_s7 }
  0x38   : > { %v305_v22 = vld [vmem:[%s866_s30] sm:$0xff]  ;;  %v306_v23 = vld [vmem:[%s866_s30 + $0x8] sm:$0xff]  ;;  %v307_v27 = vld [vmem:[%s866_s30 + $0x10] sm:$0xff]  ;;  %s344_s18 = sadd.s32 %s469_s9, %s342_s17  ;;  %s347_s6 = sshll.u32 %s881_s4, 4  ;;  %s930_s6 = int_to_ptr.vmem [resolvable:$true] %s347_s6 }
  0x39   : > { %v313_v25 = vsel %vm857_vm9, %v305_v22, 0.0  ;;  %v314_v26 = vsel %vm298_vm13, %v306_v23, 0.0  ;;  %vm288_vm1 = vmand %vm278_vm14, %vm837_vm5  ;;  %v308_v31 = vld [vmem:[%s866_s30 + $0x18] sm:$0xff]  ;;  %v309_v35 = vld [vmem:[%s866_s30 + $0x20] sm:$0xff]  ;;  %s465_s16 = sshll.u32 %s344_s18, 7  ;;  %s946_s5 = scalar_lea.sflag [#allocation5], %s196_s11 }
  0x3a   : > { %321 = vst [vmem:[%s881_s4] sm:$0xff] %v313_v25  ;;  %322 = vst [vmem:[%s881_s4 + $0x8] sm:$0xff] %v314_v26  ;;  %v310_v38 = vld [vmem:[%s866_s30 + $0x28] sm:$0xff]  ;;  %v311_v40 = vld [vmem:[%s866_s30 + $0x30] sm:$0xff]  ;;  %s941_s3 = scalar_lea.hbm %s1006_s2, %s465_s16  ;;  %s573_s10 = scalar_lea.vmem %s930_s6, 1024 }
  0x3b   : > { %vm299_vm2 = vmand %vm288_vm1, %vm850_vm7  ;;  %vm274_vm1 = vcmp.lt.s32.totalorder %v250_v33, %v830_v12  ;;  %v312_v42 = vld [vmem:[%s866_s30 + $0x38] sm:$0xff]  ;;  %p574_p8 = scmp.ne.s32.totalorder %s930_s6, %s573_s10  ;;  %s579_s30 = scalar_lea.vmem %s578_s23, 2048 }
  0x3c   : > { %v315_v30 = vsel %vm299_vm2, %v307_v27, 0.0  ;;  %vm279_vm3 = vmand %vm261_vm15, %vm271_vm0  ;;  %vm264_vm0 = vcmp.ge.s32.totalorder %v250_v33, %v818_v5  ;;  %p580_p13 = scmp.lt.s32.totalorder %s930_s6, %s578_s23  ;;  %p581_p0 = scmp.lt.s32.totalorder %s579_s30, %s573_s10 }
  0x3d   : > { %323 = vst [vmem:[%s881_s4 + $0x10] sm:$0xff] %v315_v30  ;;  %vm289_vm8 = vmand %vm279_vm3, %vm837_vm5  ;;  %p575_p9 = pnand %p574_p8, %p772_p10 }
  0x3e   : > { %vm300_vm9 = vmand %vm289_vm8, %vm850_vm7  ;;  %vm275_vm8 = vcmp.lt.s32.totalorder %v251_v36, %v830_v12  ;;  %p582_p1 = por %p581_p0, %p580_p13 }
  0x3f   : > { %v316_v34 = vsel %vm300_vm9, %v308_v31, 0.0  ;;  %vm280_vm10 = vmand %vm262_vm4, %vm272_vm6  ;;  %vm265_vm6 = vcmp.ge.s32.totalorder %v251_v36, %v818_v5  ;;  %p576_p11 = pneg %p575_p9 }
  0x40   : > { %324 = vst [vmem:[%s881_s4 + $0x18] sm:$0xff] %v316_v34  ;;  %vm290_vm13 = vmand %vm280_vm10, %vm837_vm5 }
  0x41   : > { %vm301_vm14 = vmand %vm290_vm13, %vm850_vm7  ;;  %p583_p2 = pnand %p582_p1, %p576_p11 }
  0x42   : > { %v317_v37 = vsel %vm301_vm14, %v309_v35, 0.0  ;;  %vm281_vm15 = vmand %vm263_vm11, %vm273_vm12 }
  0x43   : > { %325 = vst [vmem:[%s881_s4 + $0x20] sm:$0xff] %v317_v37  ;;  %vm291_vm2 = vmand %vm281_vm15, %vm837_vm5 }
  0x44   : > { %vm302_vm3 = vmand %vm291_vm2, %vm850_vm7 }
  0x45   : > { %v318_v39 = vsel %vm302_vm3, %v310_v38, 0.0  ;;  %vm282_vm4 = vmand %vm264_vm0, %vm274_vm1 }
  0x46   : > { %326 = vst [vmem:[%s881_s4 + $0x28] sm:$0xff] %v318_v39  ;;  %vm292_vm9 = vmand %vm282_vm4, %vm837_vm5 }
  0x47   : > { %vm303_vm10 = vmand %vm292_vm9, %vm850_vm7 }
  0x48   : > { %v319_v41 = vsel %vm303_vm10, %v311_v40, 0.0  ;;  %vm283_vm11 = vmand %vm265_vm6, %vm275_vm8 }
  0x49   : > { %327 = vst [vmem:[%s881_s4 + $0x30] sm:$0xff] %v319_v41  ;;  %vm293_vm12 = vmand %vm283_vm11, %vm837_vm5 }
  0x4a   : > { %vm304_vm13 = vmand %vm293_vm12, %vm850_vm7 }
  0x4b   : > { %v320_v43 = vsel %vm304_vm13, %v312_v42, 0.0 }
  0x4c   : > { %328 = vst [vmem:[%s881_s4 + $0x38] sm:$0xff] %v320_v43 }
  0x4d   : > { %586 = shalt.err (!%p583_p2)
}
  0x4e   : > { %s587_s11 = scalar_lea.hbm %s941_s3, 1024  ;;  %s591_s9 = scalar_lea.hbm %s1006_s2, 30720 }
  0x4f   : > { %p588_p3 = scmp.ne.s32.totalorder %s941_s3, %s587_s11  ;;  %p592_p6 = scmp.lt.u32.totalorder %s941_s3, %s1006_s2 }
  0x50   : > { %p593_p7 = scmp.lt.u32.totalorder %s591_s9, %s587_s11  ;;  %p595_p9 = scmp.lt.u32.totalorder %s587_s11, %s941_s3 }
  0x51   : > { %p589_p4 = pnand %p588_p3, %p772_p10 }
  0x52   : > { %p594_p8 = por %p593_p7, %p592_p6 }
  0x53   : > { %p590_p5 = pneg %p589_p4 }
  0x54   : > { %p596_p11 = por %p595_p9, %p594_p8 }
  0x56   : > { %p597_p13 = pnand %p596_p11, %p590_p5 }
  0x58   : > { %600 = shalt.err (!%p597_p13)
}
  0x59   : > { %s689_s16 = smov 128   ;;  %s690_s12 = smov 256  }
  0x5a   : > { %s691_s26 = smov 8  }
  0x5b   : > { %470 = dma.vmem_to_hbm [thread:$0]  (%p772_p10), %s930_s6, 1024, %s941_s3, %s946_s5, %s689_s16, %s690_s12, %s691_s26  }
  0x5c PF: > { %p476_p0 = scmp.ge.s32.totalorder %s685_s22, 2  ;;  %s362_s10 = sand.u32 1, %s649_s14  }
  0x5d   : > { %s363_s13 = scalar_lea.sflag [#allocation5], %s362_s10 }
  0x5e   : > { %p473_p1 = pnand %p476_p0, %p779_p12 }
  0x60   : > { %644 = dma.done.wait (!%p473_p1), %s363_s13, 1024  }
  0x61   : > { %646 = vsyncadd (!%p473_p1), %s363_s13, 4294966272  ;;  %s21_s22 = sadd.s32 1, %s685_s22   ;;  %s1015_s14 = smov %s653_s15 }
  0x62   : > { %p18_p2 = scmp.ge.s32.totalorder %s21_s22, 32   ;;  %s1016_s15 = smov %s657_s0 }
  0x63   : > { %s1017_s0 = smov %s795_s8  ;;  %s1018_s16 = smov %s673_s19 }
  0x64   : > { %s1019_s17 = smov %s677_s20  ;;  %s1020_s18 = smov %s681_s21 }
  0x65   : > { %s1021_s19 = smov %s1025_s24  ;;  %s1022_s20 = smov %s1029_s25 }
  0x66   : > { %s1023_s21 = smov %s1033_s27  ;;  %20 = sbr.rel (!%p18_p2) target bundleno = 21 (0x15), region = 59 }
  0x6d   :  { %368 = vsyncpa [#allocation5], 1 }
  0x6e   :  { %370 = vsyncpa [#allocation5 + $0x1], 1 }

// kernel: _device_forward.4
= control target key start
LH: loop header
LB: loop body
LE: loop exit
PB: predicated region body
PF: predicated region fallthrough
CT: control target
= control target key end

     0   :  { %13 = vsyncpa [#allocation4], 0  ;;  %s818_s25 = smov 2   ;;  %v819_v4 = vmov 0   ;;  %s1401_s0 = inlined_call_operand.vmem [shape: f32[40,8], index: 0, kind: input, shape index: {}]   ;;  %s1402_s1 = inlined_call_operand.vmem [shape: f32[8,128], index: 1, kind: input, shape index: {}]   ;;  %s1403_s2 = inlined_call_operand.vmem [shape: f32[1,128], index: 2, kind: input, shape index: {}]   ;;  %s1404_s3 = inlined_call_operand.<no memory space> [shape: f32[1], index: 3, kind: input, shape index: {}]   ;;  %s1405_s4 = inlined_call_operand.hbm [shape: f32[1,128], index: 4, kind: output, shape index: {0}]   ;;  %s1406_s5 = inlined_call_operand.hbm [shape: f32[8,128], index: 5, kind: output, shape index: {1}]   ;;  %s1407_s6 = inlined_call_operand.vmem [shape: f32[8,128], index: 6, kind: output, shape index: {2}]  }
   0x1   :  { %v869_v0 = vld [vmem:[%s1401_s0 + $0x8] sm:$0xff]  ;;  %v874_v1 = vld [vmem:[%s1401_s0] sm:$0xff]  ;;  %v881_v2 = vld [vmem:[%s1401_s0 + $0x10] sm:$0xff]  ;;  %741 = vset.pattern.permute.xlu1 %v819_v4  ;;  %740 = vset.pattern.permute.xlu0 %v819_v4 }
   0x2   :  { %258 = vrot.lane.b32.xlu1 %v869_v0, %s818_s25  ;;  %256 = vrot.lane.b32.xlu0 %v874_v1, %s818_s25  ;;  %v886_v3 = vld [vmem:[%s1401_s0 + $0x20] sm:$0xff] }
   0x3   :  { %14 = vsyncpa [#allocation6], 0  ;;  %v895_v5 = vld [vmem:[%s1401_s0 + $0x18] sm:$0xff]  ;;  %v820_v6 = vmov 2   ;;  %v821_v7 = vmov 1   ;;  %v822_v8 = vmov 3   ;;  %v68_v20 = vlaneseq }
   0x4   :  { %v823_v9 = vmov 0.0   ;;  %s824_s9 = smov 127   ;;  %v964_v22 = vld [vmem:[%s1402_s1] sm:$0x1]  ;;  %v969_v23 = vld [vmem:[%s1402_s1 + $0x2] sm:$0x1] }
   0x5   :  { %683 = vst [vmem:[%s1407_s6 + $0x5] sm:$0x7] %v823_v9  ;;  %671 = vst [vmem:[#allocation5 + $0x4] sm:$0xf] %v823_v9  ;;  %v959_v21 = vshrl.u32 %v68_v20, 7  ;;  %v39_v26 = vadd.f32 %v969_v23, %v964_v22  ;;  %s826_s19 = smov 5  }
   0x6   :  { %260 = vrot.lane.b32.xlu1 %v881_v2, %s818_s25  ;;  %264 = vrot.lane.b32.xlu0 %v886_v3, %s818_s25  ;;  %v981_v27 = vld [vmem:[%s1402_s1 + $0x1] sm:$0x1]  ;;  %v986_v28 = vld [vmem:[%s1402_s1 + $0x3] sm:$0x1]  ;;  %s827_s20 = smov 1   ;;  %s829_s28 = smov [#allocation3]  }
   0x7   :  { %v972_v24 = vsub.s32 0, %v959_v21  ;;  %v41_v32 = vadd.f32 %v986_v28, %v981_v27  ;;  %v40_v33 = vmul.f32 0.5, %v39_v26  ;;  %v37_v37 = vld [vmem:[%s1403_s2] sm:$0x1]  ;;  %s825_s2 = smov 6   ;;  %s690_s29 = sshll.u32 %s829_s28, 4  ;;  %s691_s29 = int_to_ptr.vmem [resolvable:$true] %s690_s29 }
   0x8   :  { %vm38_vm0 = vcmp.gt.f32.partialorder %v37_v37, 0.5  ;;  %s830_s30 = smov [#allocation5]   ;;  %s774_s10 = scalar_lea.vmem %s691_s29, 32 }
   0x9   :  { %v990_v29 = vrot.slane %v964_v22, %v972_v24  ;;  %v994_v31 = vrot.slane %v969_v23, %v972_v24  ;;  %v42_v40 = vmul.f32 0.5, %v41_v32  ;;  %v1006_v41 = vrot.slane %v40_v33, %v972_v24  ;;  %s700_s7 = sshll.u32 %s830_s30, 4  ;;  %p775_p1 = scmp.lt.s32.totalorder %s691_s29, %s691_s29  ;;  %s1367_s7 = int_to_ptr.vmem [resolvable:$true] %s700_s7 }
   0xa   :  { %65 = vperm.xlu1 %741, %v886_v3   ;;  %262 = vrot.lane.b32.xlu0 %v895_v5, %s818_s25  ;;  %v171_v44 = vsel %vm38_vm0, 1, %v819_v4  ;;  %v1016_v46 = vrot.slane %v981_v27, %v972_v24  ;;  %v1021_v48 = vrot.slane %v986_v28, %v972_v24 }
   0xb   :  { %v1011_v43 = vrot.slane %v42_v40, %v972_v24  ;;  %v175_v49 = vrot.slane %v171_v44, %v972_v24 }
   0xd   :  { %vm1029_vm7 = vcmp.eq.s32.totalorder %v175_v49, 1 }
   0xe   :  { %742 = vset.pattern.permute.xlu1 %v820_v6  ;;  %45 = vperm.xlu0 %740, %v874_v1  }
   0xf   :  { %78 = vperm.xlu1 %742, %v874_v1  }
  0x12   :  { %55 = vperm.xlu0 %740, %v881_v2  }
  0x13   :  { %743 = vset.pattern.permute.xlu1 %v821_v7 }
  0x14   :  { %108 = vperm.xlu1 %743, %v874_v1  }
  0x16   :  { %748 = vset.pattern.permute.xlu0 %v821_v7 }
  0x17   :  { %116 = vperm.xlu0 %748, %v881_v2  }
  0x18   :  { %124 = vperm.xlu1 %743, %v886_v3  }
  0x1b   :  { %749 = vset.pattern.permute.xlu0 %v822_v8 }
  0x1c   :  { %744 = vset.pattern.permute.xlu1 %v822_v8  ;;  %142 = vperm.xlu0 %749, %v874_v1  }
  0x1d   :  { %158 = vperm.xlu1 %744, %v886_v3  }
  0x20   :  { %150 = vperm.xlu0 %749, %v881_v2  }
  0x21   :  { %745 = vset.pattern.permute.xlu1 %v819_v4 }
  0x22   :  { %50 = vperm.xlu1 %745, %v869_v0  }
  0x24   :  { %751 = vset.pattern.permute.xlu0 %v820_v6 }
  0x25   :  { %94 = vperm.xlu0 %751, %v886_v3  }
  0x26   :  { %60 = vperm.xlu1 %745, %v895_v5  }
  0x29   :  { %86 = vperm.xlu0 %751, %v881_v2  }
  0x2a   :  { %746 = vset.pattern.permute.xlu1 %v820_v6 }
  0x2b   :  { %82 = vperm.xlu1 %746, %v869_v0  }
  0x2f   :  { %90 = vperm.xlu1 %746, %v895_v5  }
  0x33   :  { %747 = vset.pattern.permute.xlu1 %v821_v7 }
  0x34   :  { %112 = vperm.xlu1 %747, %v869_v0  }
  0x38   :  { %120 = vperm.xlu1 %747, %v895_v5  }
  0x3c   :  { %750 = vset.pattern.permute.xlu1 %v822_v8 }
  0x3d   :  { %146 = vperm.xlu1 %750, %v869_v0  }
  0x41   :  { %154 = vperm.xlu1 %750, %v895_v5  }
  0x45   :  { %752 = vset.pattern.permute.xlu1 %v820_v6 }
  0x74   :  { %v924_v10 = vpop.permute.xlu0 %256  ;;  %v926_v11 = vpop.permute.xlu1 %258 }
  0x75   :  { %v930_v12 = vsub.f32 %v874_v1, %v924_v10  ;;  %v935_v13 = vsub.f32 %v869_v0, %v926_v11 }
  0x77   :  { %281 = vrot.lane.b32.xlu1 %v930_v12, %s824_s9 }
  0x78   :  { %v937_v14 = vpop.permute.xlu0 %264  ;;  %v939_v15 = vpop.permute.xlu1 %260 }
  0x79   :  { %v943_v16 = vsub.f32 %v886_v3, %v937_v14  ;;  %v949_v17 = vsub.f32 %v881_v2, %v939_v15 }
  0x7b   :  { %283 = vrot.lane.b32.xlu1 %v935_v13, %s824_s9  ;;  %289 = vrot.lane.b32.xlu0 %v943_v16, %s824_s9 }
  0x7c   :  { %v951_v18 = vpop.permute.xlu0 %262 }
  0x7d   :  { %v955_v19 = vsub.f32 %v895_v5, %v951_v18 }
  0x7f   :  { %285 = vrot.lane.b32.xlu0 %v949_v17, %s824_s9  ;;  %287 = vrot.lane.b32.xlu1 %v955_v19, %s824_s9  ;;  %s770_s9 = scalar_lea.vmem %s691_s29, 16 }
  0x80   :  { %p771_p0 = scmp.ne.s32.totalorder %s691_s29, %s770_s9  ;;  %p776_p2 = scmp.lt.s32.totalorder %s774_s10, %s770_s9 }
  0x82   :  { %p777_p3 = por %p776_p2, %p775_p1 }
  0x84   :  { %p778_p4 = pnand %p777_p3, %p771_p0 }
  0x89   :  { %v974_v25 = vpop.permute.xlu1 %65 }
  0x8a   :  { %vm76_vm10 = vcmp.lt.f32.partialorder %v974_v25, %v1006_v41 }
  0x8d   :  { %v46_v30 = vpop.permute.xlu0 %45 }
  0x8e   :  { %v205_v34 = vmax.f32 %v990_v29, %v46_v30  ;;  %v79_v35 = vpop.permute.xlu1 %78  ;;  %vm72_vm1 = vcmp.lt.f32.partialorder %v46_v30, %v1006_v41  ;;  %v209_v30 = vmax.f32 %v990_v29, %v974_v25 }
  0x8f   :  { %v196_v36 = vmin.f32 %v994_v31, %v79_v35  ;;  %vm97_vm2 = vcmp.lt.f32.partialorder %v1006_v41, %v79_v35 }
  0x90   :  { %vm102_vm3 = vmand %vm72_vm1, %vm97_vm2 }
  0x91   :  { %v210_v38 = vsub.f32 %v196_v36, %v205_v34  ;;  %v1003_v39 = vpop.permute.xlu0 %55 }
  0x92   :  { %vm74_vm0 = vcmp.lt.f32.partialorder %v1003_v39, %v1006_v41  ;;  %v207_v34 = vmax.f32 %v990_v29, %v1003_v39 }
  0x93   :  { %v109_v42 = vpop.permute.xlu1 %108  ;;  %v215_v58 = vmax.f32 %v210_v38, 0.0 }
  0x94   :  { %vm131_vm4 = vcmp.lt.f32.partialorder %v109_v42, %v1011_v43  ;;  %v233_v50 = vmax.f32 %v1016_v46, %v109_v42 }
  0x95   :  { %vm136_vm5 = vmand %vm102_vm3, %vm131_vm4 }
  0x96   :  { %v117_v45 = vpop.permute.xlu0 %116 }
  0x97   :  { %v125_v47 = vpop.permute.xlu1 %124  ;;  %v235_v59 = vmax.f32 %v1016_v46, %v117_v45  ;;  %vm133_vm2 = vcmp.lt.f32.partialorder %v117_v45, %v1011_v43 }
  0x98   :  { %v237_v51 = vmax.f32 %v1016_v46, %v125_v47  ;;  %vm135_vm11 = vcmp.lt.f32.partialorder %v125_v47, %v1011_v43 }
  0x9b   :  { %v143_v52 = vpop.permute.xlu0 %142 }
  0x9c   :  { %vm161_vm6 = vcmp.lt.f32.partialorder %v1011_v43, %v143_v52  ;;  %v224_v53 = vmin.f32 %v1021_v48, %v143_v52  ;;  %v159_v54 = vpop.permute.xlu1 %158 }
  0x9d   :  { %v228_v55 = vmin.f32 %v1021_v48, %v159_v54  ;;  %vm1033_vm8 = vmand %vm136_vm5, %vm161_vm6  ;;  %vm165_vm12 = vcmp.lt.f32.partialorder %v1011_v43, %v159_v54 }
  0x9e   :  { %v238_v60 = vsub.f32 %v224_v53, %v233_v50  ;;  %vm177_vm9 = vmand %vm1033_vm8, %vm1029_vm7 }
  0x9f   :  { %v242_v61 = vsub.f32 %v228_v55, %v237_v51  ;;  %v151_v62 = vpop.permute.xlu0 %150  ;;  %v1049_v6 = vsel %vm177_vm9, 1.0, %v823_v9 }
  0xa0   :  { %v243_v63 = vmax.f32 %v238_v60, 0.0  ;;  %v226_v4 = vmin.f32 %v1021_v48, %v151_v62  ;;  %vm163_vm6 = vcmp.lt.f32.partialorder %v1011_v43, %v151_v62 }
  0xa1   :  { %v51_v7 = vpop.permute.xlu1 %50  ;;  %v247_v35 = vmax.f32 %v242_v61, 0.0 }
  0xa2   :  { %v240_v8 = vsub.f32 %v226_v4, %v235_v59  ;;  %v1051_v20 = vmul.f32 %v243_v63, %v215_v58  ;;  %v206_v38 = vmax.f32 %v990_v29, %v51_v7 }
  0xa3   :  { %380 = vmax.xlane.f32.xlu1 %v1049_v6 }
  0xa4   :  { %v95_v26 = vpop.permute.xlu0 %94  ;;  %v245_v52 = vmax.f32 %v240_v8, 0.0 }
  0xa5   :  { %vm101_vm13 = vcmp.lt.f32.partialorder %v1006_v41, %v95_v26  ;;  %v200_v32 = vmin.f32 %v994_v31, %v95_v26  ;;  %v61_v33 = vpop.permute.xlu1 %60 }
  0xa6   :  { %vm106_vm14 = vmand %vm76_vm10, %vm101_vm13  ;;  %vm75_vm15 = vcmp.lt.f32.partialorder %v61_v33, %v1006_v41  ;;  %v208_v53 = vmax.f32 %v990_v29, %v61_v33 }
  0xa7   :  { %v214_v36 = vsub.f32 %v200_v32, %v209_v30  ;;  %vm140_vm1 = vmand %vm106_vm14, %vm135_vm11 }
  0xa8   :  { %vm1068_vm3 = vmand %vm140_vm1, %vm165_vm12  ;;  %v87_v37 = vpop.permute.xlu0 %86  ;;  %vm73_vm1 = vcmp.lt.f32.partialorder %v51_v7, %v1006_v41 }
  0xa9   :  { %v219_v40 = vmax.f32 %v214_v36, 0.0  ;;  %vm181_vm4 = vmand %vm1068_vm3, %vm1029_vm7  ;;  %vm99_vm5 = vcmp.lt.f32.partialorder %v1006_v41, %v87_v37  ;;  %v198_v42 = vmin.f32 %v994_v31, %v87_v37 }
  0xaa   :  { %v1086_v44 = vsel %vm181_vm4, 1.0, %v823_v9  ;;  %v83_v47 = vpop.permute.xlu1 %82  ;;  %vm104_vm10 = vmand %vm74_vm0, %vm99_vm5 }
  0xab   :  { %388 = vmax.xlane.f32.xlu0 %v1086_v44  ;;  %v197_v49 = vmin.f32 %v994_v31, %v83_v47  ;;  %v212_v50 = vsub.f32 %v198_v42, %v207_v34  ;;  %vm138_vm11 = vmand %vm104_vm10, %vm133_vm2  ;;  %v1095_v51 = vmul.f32 %v247_v35, %v219_v40  ;;  %vm98_vm2 = vcmp.lt.f32.partialorder %v1006_v41, %v83_v47 }
  0xac   :  { %vm1098_vm12 = vmand %vm138_vm11, %vm163_vm6 }
  0xad   :  { %v211_v54 = vsub.f32 %v197_v49, %v206_v38  ;;  %v217_v55 = vmax.f32 %v212_v50, 0.0  ;;  %vm1408_vm13 = vmand %vm1098_vm12, %vm1029_vm7 }
  0xae   :  { %v91_v39 = vpop.permute.xlu1 %90  ;;  %v1114_v29 = vsel %vm1408_vm13, 1.0, %v823_v9  ;;  %vm103_vm5 = vmand %vm73_vm1, %vm98_vm2 }
  0xaf   :  { %vm100_vm14 = vcmp.lt.f32.partialorder %v1006_v41, %v91_v39  ;;  %v199_v45 = vmin.f32 %v994_v31, %v91_v39  ;;  %384 = vmax.xlane.f32.xlu1 %v1114_v29  ;;  %v1119_v59 = vmul.f32 %v245_v52, %v217_v55  ;;  %v216_v33 = vmax.f32 %v211_v54, 0.0 }
  0xb0   :  { %vm105_vm0 = vmand %vm75_vm15, %vm100_vm14 }
  0xb1   :  { %v213_v60 = vsub.f32 %v199_v45, %v208_v53 }
  0xb3   :  { %v113_v61 = vpop.permute.xlu1 %112  ;;  %v218_v38 = vmax.f32 %v213_v60, 0.0 }
  0xb4   :  { %vm132_vm6 = vcmp.lt.f32.partialorder %v113_v61, %v1011_v43  ;;  %v234_v63 = vmax.f32 %v1016_v46, %v113_v61 }
  0xb5   :  { %vm137_vm15 = vmand %vm103_vm5, %vm132_vm6 }
  0xb7   :  { %v121_v31 = vpop.permute.xlu1 %120 }
  0xb8   :  { %vm134_vm10 = vcmp.lt.f32.partialorder %v121_v31, %v1011_v43  ;;  %v236_v8 = vmax.f32 %v1016_v46, %v121_v31 }
  0xb9   :  { %vm1125_vm11 = vmand %vm105_vm0, %vm134_vm10 }
  0xbc   :  { %v147_v4 = vpop.permute.xlu1 %146 }
  0xbd   :  { %vm162_vm14 = vcmp.lt.f32.partialorder %v1011_v43, %v147_v4  ;;  %v225_v7 = vmin.f32 %v1021_v48, %v147_v4 }
  0xbe   :  { %vm1132_vm13 = vmand %vm137_vm15, %vm162_vm14  ;;  %vm32_vm15 = vcmp.gt.f32.partialorder %v886_v3, 0.5 }
  0xbf   :  { %v239_v26 = vsub.f32 %v225_v7, %v234_v63  ;;  %vm178_vm0 = vmand %vm1132_vm13, %vm1029_vm7 }
  0xc0   :  { %v155_v30 = vpop.permute.xlu1 %154  ;;  %v1147_v32 = vsel %vm178_vm0, 1.0, %v823_v9 }
  0xc1   :  { %v244_v34 = vmax.f32 %v239_v26, 0.0  ;;  %vm164_vm1 = vcmp.lt.f32.partialorder %v1011_v43, %v155_v30  ;;  %v227_v46 = vmin.f32 %v1021_v48, %v155_v30  ;;  %382 = vmax.xlane.f32.xlu0 %v1147_v32 }
  0xc2   :  { %vm1154_vm2 = vmand %vm1125_vm11, %vm164_vm1 }
  0xc3   :  { %v241_v36 = vsub.f32 %v227_v46, %v236_v8  ;;  %vm180_vm5 = vmand %vm1154_vm2, %vm1029_vm7  ;;  %v1162_v37 = vmul.f32 %v244_v34, %v216_v33  ;;  %vm423_vm2 = vcmask 56368  }
  0xc5   :  { %v246_v43 = vmax.f32 %v241_v36, 0.0 }
  0xc7   :  { %v1164_v40 = vmul.f32 %v246_v43, %v218_v38 }
  0xe9   :  { %v282_v48 = vpop.permute.xlu1 %281 }
  0xea   :  { %v296_v42 = vmul.f32 %v282_v48, %v930_v12  ;;  %v1183_v12 = vsel %vm180_vm5, 1.0, %v823_v9 }
  0xec   :  { %307 = vperm.xlu1 %752, %v296_v42  }
  0xed   :  { %v284_v47 = vpop.permute.xlu1 %283  ;;  %v290_v49 = vpop.permute.xlu0 %289 }
  0xee   :  { %v297_v50 = vmul.f32 %v284_v47, %v935_v13  ;;  %v300_v52 = vmul.f32 %v290_v49, %v943_v16  ;;  %v253_v13 = vsub.f32 %v969_v23, %v964_v22  ;;  %v254_v16 = vsub.f32 %v986_v28, %v981_v27 }
  0xf0   :  { %312 = vperm.xlu1 %752, %v297_v50   ;;  %327 = vperm.xlu0 %751, %v300_v52  }
  0xf1   :  { %v288_v53 = vpop.permute.xlu1 %287  ;;  %v286_v54 = vpop.permute.xlu0 %285 }
  0xf2   :  { %v299_v55 = vmul.f32 %v288_v53, %v955_v19  ;;  %v298_v39 = vmul.f32 %v286_v54, %v949_v17  ;;  %v255_v19 = vmul.f32 %v254_v16, %v253_v13 }
  0xf4   :  { %322 = vperm.xlu0 %751, %v299_v55   ;;  %317 = vperm.xlu1 %752, %v298_v39   ;;  %v304_v61 = vrot.slane %v255_v19, %v972_v24 }
  0xf8   :  { %471 = vrot.lane.b32.xlu1 %v869_v0, %s825_s2 }
  0xfc   :  { %504 = vrot.lane.b32.xlu1 %v874_v1, %s826_s19 }
 0x100   :  { %473 = vrot.lane.b32.xlu1 %v881_v2, %s825_s2 }
 0x113   :  { %386 = vmax.xlane.f32.xlu0 %v1183_v12 }
 0x129   :  { %469 = vrot.lane.b32.xlu0 %v874_v1, %s825_s2 }
 0x12d   :  { %506 = vrot.lane.b32.xlu0 %v869_v0, %s826_s19 }
 0x130   :  { %v1194_v17 = vpop.xlane.xlu1 %380 }
 0x138   :  { %v1196_v45 = vpop.xlane.xlu0 %388 }
 0x139   :  { %vm394_vm14 = vcmp.gt.f32.partialorder %v1196_v45, 0.5 }
 0x13a   :  { %vm400_vm1 = vmand %vm32_vm15, %vm394_vm14 }
 0x13c   :  { %v1198_v60 = vpop.xlane.xlu1 %384 }
 0x14e   :  { %v1201_v31 = vpop.xlane.xlu0 %382 }
 0x16b   :  { %v308_v62 = vpop.permute.xlu1 %307 }
 0x16c   :  { %v330_v63 = vadd.f32 %v308_v62, %v304_v61 }
 0x16e   :  { %v335_v4 = vsub.f32 %v330_v63, %v1051_v20 }
 0x16f   :  { %v313_v7 = vpop.permute.xlu1 %312  ;;  %v328_v8 = vpop.permute.xlu0 %327 }
 0x170   :  { %v340_v26 = vmax.f32 %v335_v4, 1e-12  ;;  %v331_v30 = vadd.f32 %v313_v7, %v304_v61  ;;  %v334_v33 = vadd.f32 %v328_v8, %v304_v61  ;;  %vm355_vm6 = vcmp.gt.f32.partialorder %v335_v4, 0.0 }
 0x171   :  { %v828_v8 = vmov 6  }
 0x172   :  { %760 = vrcp.f32 %v340_v26  ;;  %v336_v34 = vsub.f32 %v331_v30, %v1162_v37  ;;  %v339_v46 = vsub.f32 %v334_v33, %v1095_v51  ;;  %759 = vset.pattern.permute.xlu1 %v828_v8  ;;  %753 = vset.pattern.permute.xlu0 %v828_v8  ;;  %v401_v33 = vstv %s1404_s3 }
 0x173   :  { %v318_v36 = vpop.permute.xlu1 %317 }
 0x174   :  { %v341_v38 = vmax.f32 %v336_v34, 1e-12  ;;  %v344_v43 = vmax.f32 %v339_v46, 1e-12  ;;  %v332_v24 = vadd.f32 %v318_v36, %v304_v61  ;;  %vm359_vm10 = vcmp.gt.f32.partialorder %v339_v46, 0.0 }
 0x175   :  { %vm356_vm11 = vcmp.gt.f32.partialorder %v336_v34, 0.0  ;;  %v1271_v36 = vadd.s32 32, %v959_v21 }
 0x176   :  { %762 = vrcp.f32 %v341_v38  ;;  %v337_v48 = vsub.f32 %v332_v24, %v1119_v59 }
 0x177   :  { %764 = vrcp.f32 %v344_v43  ;;  %v1255_v35 = vpop.permute.xlu1 %471 }
 0x178   :  { %v342_v42 = vmax.f32 %v337_v48, 1e-12  ;;  %vm357_vm8 = vcmp.gt.f32.partialorder %v337_v48, 0.0 }
 0x17a   :  { %766 = vrcp.f32 %v342_v42 }
 0x17b   :  { %v1259_v30 = vpop.permute.xlu1 %504 }
 0x17c   :  { %v761_v47 = vpop.eup %760 }
 0x17d   :  { %v350_v49 = vmul.f32 %v761_v47, %v1051_v20 }
 0x17f   :  { %v360_v50 = vsel %vm355_vm6, %v350_v49, 0.0  ;;  %v1266_v46 = vpop.permute.xlu1 %473  ;;  %vm29_vm6 = vcmp.gt.f32.partialorder %v869_v0, 0.5 }
 0x180   :  { %v763_v52 = vpop.eup %762  ;;  %v365_v53 = vsel %vm177_vm9, %v360_v50, -1.0  ;;  %vm1423_vm9 = vmand %vm1098_vm12, %vm1029_vm7  ;;  %vm28_vm7 = vcmp.gt.f32.partialorder %v874_v1, 0.5  ;;  %v415_v50 = vadd.s32 16, %v959_v21 }
 0x181   :  { %v765_v54 = vpop.eup %764  ;;  %370 = vmax.xlane.f32.xlu0 %v365_v53  ;;  %v351_v39 = vmul.f32 %v763_v52, %v1162_v37  ;;  %v416_v52 = vadd.s32 24, %v959_v21 }
 0x182   :  { %v354_v55 = vmul.f32 %v765_v54, %v1095_v51 }
 0x183   :  { %v361_v19 = vsel %vm356_vm11, %v351_v39, 0.0 }
 0x184   :  { %v767_v13 = vpop.eup %766  ;;  %v364_v16 = vsel %vm359_vm10, %v354_v55, 0.0  ;;  %v366_v25 = vsel %vm178_vm0, %v361_v19, -1.0  ;;  %vm391_vm10 = vcmp.gt.f32.partialorder %v1201_v31, 0.5 }
 0x185   :  { %v369_v20 = vsel %vm181_vm4, %v364_v16, -1.0  ;;  %v352_v57 = vmul.f32 %v767_v13, %v1119_v59  ;;  %v323_v59 = vpop.permute.xlu0 %322  ;;  %vm390_vm4 = vcmp.gt.f32.partialorder %v1194_v17, 0.5 }
 0x186   :  { %378 = vmax.xlane.f32.xlu1 %v369_v20  ;;  %v333_v37 = vadd.f32 %v323_v59, %v304_v61  ;;  %vm396_vm13 = vmand %vm28_vm7, %vm390_vm4 }
 0x187   :  { %v362_v62 = vsel %vm357_vm8, %v352_v57, 0.0  ;;  %vm397_vm8 = vmand %vm29_vm6, %vm391_vm10 }
 0x188   :  { %v367_v51 = vsel %vm1423_vm9, %v362_v62, -1.0  ;;  %v338_v58 = vsub.f32 %v333_v37, %v1164_v40 }
 0x189   :  { %374 = vmax.xlane.f32.xlu0 %v367_v51 }
 0x18a   :  { %372 = vmax.xlane.f32.xlu1 %v366_v25  ;;  %v343_v63 = vmax.f32 %v338_v58, 1e-12  ;;  %vm358_vm3 = vcmp.gt.f32.partialorder %v338_v58, 0.0 }
 0x18c   :  { %768 = vrcp.f32 %v343_v63 }
 0x196   :  { %v769_v41 = vpop.eup %768 }
 0x197   :  { %v353_v61 = vmul.f32 %v769_v41, %v1164_v40 }
 0x199   :  { %v363_v4 = vsel %vm358_vm3, %v353_v61, 0.0 }
 0x19a   :  { %v368_v7 = vsel %vm180_vm5, %v363_v4, -1.0 }
 0x19b   :  { %475 = vrot.lane.b32.xlu1 %v895_v5, %s825_s2 }
 0x19f   :  { %508 = vrot.lane.b32.xlu0 %v881_v2, %s826_s19 }
 0x1a0   :  { %v387_v40 = vpop.xlane.xlu0 %386 }
 0x1a3   :  { %510 = vrot.lane.b32.xlu0 %v895_v5, %s826_s19 }
 0x1a4   :  { %v1253_v26 = vpop.permute.xlu0 %469 }
 0x1a7   :  { %561 = vrot.lane.b32.xlu0 %v869_v0, %s827_s20 }
 0x1a8   :  { %v1257_v56 = vpop.permute.xlu0 %506 }
 0x1ab   :  { %512 = vrot.lane.b32.xlu0 %v886_v3, %s826_s19 }
 0x1af   :  { %565 = vrot.lane.b32.xlu0 %v895_v5, %s827_s20 }
 0x1bf   :  { %376 = vmax.xlane.f32.xlu1 %v368_v7 }
 0x1d0   :  { %559 = vrot.lane.b32.xlu1 %v874_v1, %s827_s20 }
 0x1d4   :  { %477 = vrot.lane.b32.xlu1 %v886_v3, %s825_s2 }
 0x1d8   :  { %563 = vrot.lane.b32.xlu1 %v881_v2, %s827_s20 }
 0x1dc   :  { %567 = vrot.lane.b32.xlu1 %v886_v3, %s827_s20  ;;  %v414_v3 = vadd.s32 8, %v959_v21 }
 0x20e   :  { %v371_v34 = vpop.xlane.xlu0 %370 }
 0x20f   :  { %vm402_vm12 = vcmp.ge.f32.partialorder %v371_v34, %v401_v33 }
 0x210   :  { %vm407_vm0 = vmand %vm396_vm13, %vm402_vm12  ;;  %vm30_vm12 = vcmp.gt.f32.partialorder %v881_v2, 0.5  ;;  %vm392_vm13 = vcmp.gt.f32.partialorder %v1198_v60, 0.5 }
 0x211   :  { %v418_v1 = vsel %vm407_vm0, %v959_v21, 40  ;;  %vm398_vm14 = vmand %vm30_vm12, %vm392_vm13  ;;  %vm31_vm0 = vcmp.gt.f32.partialorder %v895_v5, 0.5 }
 0x212   :  { %v424_v45 = vsel %vm423_vm2, %v418_v1, 2147483647 }
 0x213   :  { %v379_v38 = vpop.xlane.xlu1 %378 }
 0x214   :  { %vm406_vm5 = vcmp.ge.f32.partialorder %v379_v38, %v401_v33 }
 0x215   :  { %vm411_vm11 = vmand %vm400_vm1, %vm406_vm5  ;;  %vm393_vm1 = vcmp.gt.f32.partialorder %v387_v40, 0.5 }
 0x216   :  { %v422_v17 = vsel %vm411_vm11, %v1271_v36, 40  ;;  %v375_v47 = vpop.xlane.xlu0 %374  ;;  %vm399_vm6 = vmand %vm31_vm0, %vm393_vm1 }
 0x217   :  { %v428_v43 = vsel %vm423_vm2, %v422_v17, 2147483647  ;;  %v373_v24 = vpop.xlane.xlu1 %372  ;;  %vm404_vm15 = vcmp.ge.f32.partialorder %v375_v47, %v401_v33 }
 0x218   :  { %vm429_vm9 = vcmp.lt.s32.totalorder %v424_v45, %v428_v43  ;;  %vm403_vm3 = vcmp.ge.f32.partialorder %v373_v24, %v401_v33  ;;  %vm409_vm5 = vmand %vm398_vm14, %vm404_vm15 }
 0x219   :  { %vm408_vm7 = vmand %vm397_vm8, %vm403_vm3  ;;  %v430_v48 = vsel %vm429_vm9, %v424_v45, %v428_v43  ;;  %v420_v54 = vsel %vm409_vm5, %v415_v50, 40 }
 0x21a   :  { %v419_v42 = vsel %vm408_vm7, %v414_v3, 40  ;;  %v426_v2 = vsel %vm423_vm2, %v420_v54, 2147483647  ;;  %v509_v39 = vpop.permute.xlu0 %508 }
 0x21b   :  { %v425_v0 = vsel %vm423_vm2, %v419_v42, 2147483647  ;;  %v476_v49 = vpop.permute.xlu1 %475 }
 0x21c   :  { %vm431_vm4 = vcmp.lt.s32.totalorder %v430_v48, %v425_v0 }
 0x21d   :  { %v432_v31 = vsel %vm431_vm4, %v430_v48, %v425_v0 }
 0x21e   :  { %v511_v20 = vpop.permute.xlu0 %510 }
 0x222   :  { %v562_v59 = vpop.permute.xlu0 %561 }
 0x226   :  { %v513_v41 = vpop.permute.xlu0 %512 }
 0x22a   :  { %v566_v0 = vpop.permute.xlu0 %565 }
 0x24c   :  { %v377_v53 = vpop.xlane.xlu1 %376 }
 0x24d   :  { %vm405_vm10 = vcmp.ge.f32.partialorder %v377_v53, %v401_v33 }
 0x24e   :  { %vm410_vm11 = vmand %vm399_vm6, %vm405_vm10 }
 0x24f   :  { %v421_v55 = vsel %vm410_vm11, %v416_v52, 40 }
 0x250   :  { %v427_v60 = vsel %vm423_vm2, %v421_v55, 2147483647  ;;  %v560_v19 = vpop.permute.xlu1 %559 }
 0x251   :  { %vm433_vm8 = vcmp.lt.s32.totalorder %v426_v2, %v427_v60 }
 0x252   :  { %v434_v13 = vsel %vm433_vm8, %v426_v2, %v427_v60 }
 0x253   :  { %vm435_vm9 = vcmp.lt.s32.totalorder %v432_v31, %v434_v13 }
 0x254   :  { %v436_v16 = vsel %vm435_vm9, %v432_v31, %v434_v13  ;;  %v478_v37 = vpop.permute.xlu1 %477 }
 0x255   :  { %v437_v5 = vrot.slane %v436_v16, 4 }
 0x257   :  { %vm438_vm3 = vcmp.lt.s32.totalorder %v436_v16, %v437_v5 }
 0x258   :  { %v439_v57 = vsel %vm438_vm3, %v436_v16, %v437_v5  ;;  %v564_v4 = vpop.permute.xlu1 %563 }
 0x259   :  { %v440_v62 = vrot.slane %v439_v57, 2 }
 0x25b   :  { %vm441_vm7 = vcmp.lt.s32.totalorder %v439_v57, %v440_v62 }
 0x25c   :  { %v442_v51 = vsel %vm441_vm7, %v439_v57, %v440_v62 }
 0x25d   :  { %v443_v25 = vrot.slane %v442_v51, 1 }
 0x25f   :  { %vm444_vm4 = vcmp.lt.s32.totalorder %v442_v51, %v443_v25 }
 0x260   :  { %v1288_v58 = vsel %vm444_vm4, %v442_v51, %v443_v25 }
 0x261   :  { %vm446_vm12 = vcmp.lt.s32.totalorder %v1288_v58, 40  ;;  %vm450_vm13 = vcmp.eq.s32.totalorder %v416_v52, %v1288_v58  ;;  %vm447_vm15 = vcmp.eq.s32.totalorder %v959_v21, %v1288_v58  ;;  %vm448_vm14 = vcmp.eq.s32.totalorder %v414_v3, %v1288_v58  ;;  %v568_v52 = vpop.permute.xlu1 %567 }
 0x262   :  { %vm457_vm0 = vmand %vm450_vm13, %vm446_vm12  ;;  %vm449_vm1 = vcmp.eq.s32.totalorder %v415_v50, %v1288_v58  ;;  %vm451_vm6 = vcmp.eq.s32.totalorder %v1271_v36, %v1288_v58 }
 0x263   :  { %vm454_vm5 = vmand %vm447_vm15, %vm446_vm12  ;;  %v724_v63 = vsel %vm457_vm0, 1.0, %v823_v9 }
 0x264   :  { %vm455_vm10 = vmand %vm448_vm14, %vm446_vm12  ;;  %v721_v21 = vsel %vm454_vm5, 1.0, %v823_v9  ;;  %v522_v61 = vmul.f32 %v724_v63, %v511_v20  ;;  %v487_v45 = vmul.f32 %v724_v63, %v476_v49 }
 0x265   :  { %vm456_vm11 = vmand %vm449_vm1, %vm446_vm12  ;;  %v722_v7 = vsel %vm455_vm10, 1.0, %v823_v9  ;;  %v519_v8 = vmul.f32 %v721_v21, %v1259_v30  ;;  %v484_v40 = vmul.f32 %v721_v21, %v1253_v26  ;;  %v574_v36 = vmul.f32 %v721_v21, %v560_v19 }
 0x266   :  { %v723_v33 = vsel %vm456_vm11, 1.0, %v823_v9  ;;  %v520_v34 = vmul.f32 %v722_v7, %v1257_v56  ;;  %vm458_vm8 = vmand %vm451_vm6, %vm446_vm12  ;;  %v485_v38 = vmul.f32 %v722_v7, %v1255_v35  ;;  %v529_v3 = vsel %vm423_vm2, %v522_v61, 0.0 }
 0x267   :  { %v521_v1 = vmul.f32 %v723_v33, %v509_v39  ;;  %v524_v17 = vsel %vm423_vm2, %v519_v8, 0.0  ;;  %606 = vperm.xlu1 %759, %v723_v33   ;;  %v725_v26 = vsel %vm458_vm8, 1.0, %v823_v9  ;;  %v486_v43 = vmul.f32 %v723_v33, %v1266_v46 }
 0x268   :  { %v525_v30 = vsel %vm423_vm2, %v520_v34, 0.0  ;;  %v489_v56 = vsel %vm423_vm2, %v484_v40, 0.0  ;;  %v541_v48 = vmul.f32 %v723_v33, %v939_v15  ;;  %v488_v42 = vmul.f32 %v725_v26, %v478_v37 }
 0x269   :  { %v526_v24 = vadd.f32 %v525_v30, %v524_v17  ;;  %v490_v35 = vsel %vm423_vm2, %v485_v38, 0.0  ;;  %v527_v31 = vsel %vm423_vm2, %v521_v1, 0.0  ;;  %v579_v47 = vsel %vm423_vm2, %v574_v36, 0.0 }
 0x26a   :  { %v491_v49 = vadd.f32 %v490_v35, %v489_v56  ;;  %v575_v50 = vmul.f32 %v722_v7, %v562_v59  ;;  %v492_v54 = vsel %vm423_vm2, %v486_v43, 0.0  ;;  %v576_v46 = vmul.f32 %v723_v33, %v564_v4 }
 0x26b   :  { %v528_v53 = vadd.f32 %v527_v31, %v526_v24  ;;  %v523_v55 = vmul.f32 %v725_v26, %v513_v41  ;;  %611 = vperm.xlu1 %759, %v724_v63   ;;  %v494_v15 = vsel %vm423_vm2, %v487_v45, 0.0  ;;  %v577_v39 = vmul.f32 %v724_v63, %v566_v0 }
 0x26c   :  { %v493_v2 = vadd.f32 %v492_v54, %v491_v49  ;;  %v580_v60 = vsel %vm423_vm2, %v575_v50, 0.0  ;;  %v496_v16 = vsel %vm423_vm2, %v488_v42, 0.0  ;;  %v578_v20 = vmul.f32 %v725_v26, %v568_v52 }
 0x26d   :  { %v530_v13 = vadd.f32 %v529_v3, %v528_v53  ;;  %v581_v5 = vadd.f32 %v580_v60, %v579_v47  ;;  %v582_v19 = vsel %vm423_vm2, %v576_v46, 0.0  ;;  %v531_v62 = vsel %vm423_vm2, %v523_v55, 0.0 }
 0x26e   :  { %v495_v57 = vadd.f32 %v494_v15, %v493_v2  ;;  %v754_v51 = vpack.i.bf16 %v722_v7, %v721_v21  ;;  %v539_v37 = vmul.f32 %v721_v21, %v924_v10  ;;  %v540_v41 = vmul.f32 %v722_v7, %v926_v11 }
 0x26f   :  { %v583_v25 = vadd.f32 %v582_v19, %v581_v5  ;;  %v532_v59 = vadd.f32 %v531_v62, %v530_v13  ;;  %v542_v61 = vmul.f32 %v724_v63, %v951_v18  ;;  %v584_v8 = vsel %vm423_vm2, %v577_v39, 0.0 }
 0x270   :  { %v497_v4 = vadd.f32 %v496_v16, %v495_v57  ;;  %755 = vperm.xlu0 %753, %v754_v51   ;;  %v544_v34 = vsel %vm423_vm2, %v539_v37, 0.0  ;;  %v545_v36 = vsel %vm423_vm2, %v540_v41, 0.0  ;;  %v586_v1 = vsel %vm423_vm2, %v578_v20, 0.0 }
 0x271   :  { %v533_v40 = vrot.slane %v532_v59, 4  ;;  %v585_v33 = vadd.f32 %v584_v8, %v583_v25  ;;  %v546_v17 = vadd.f32 %v545_v36, %v544_v34  ;;  %v543_v11 = vmul.f32 %v725_v26, %v937_v14 }
 0x272   :  { %v498_v38 = vrot.slane %v497_v4, 4  ;;  %v547_v18 = vsel %vm423_vm2, %v541_v48, 0.0  ;;  %v549_v30 = vsel %vm423_vm2, %v542_v61, 0.0  ;;  %v726_v39 = vsel %vm446_vm12, 1.0, %v823_v9 }
 0x273   :  { %v534_v3 = vadd.f32 %v533_v40, %v532_v59  ;;  %v587_v10 = vadd.f32 %v586_v1, %v585_v33  ;;  %v548_v21 = vadd.f32 %v547_v18, %v546_v17  ;;  %v551_v35 = vsel %vm423_vm2, %v543_v11, 0.0 }
 0x274   :  { %v499_v63 = vadd.f32 %v498_v38, %v497_v4  ;;  %616 = vperm.xlu0 %753, %v725_v26  }
 0x275   :  { %v535_v7 = vrot.slane %v534_v3, 2  ;;  %v588_v45 = vrot.slane %v587_v10, 4  ;;  %v550_v56 = vadd.f32 %v549_v30, %v548_v21 }
 0x276   :  { %v500_v43 = vrot.slane %v499_v63, 2 }
 0x277   :  { %v589_v24 = vadd.f32 %v588_v45, %v587_v10  ;;  %v536_v42 = vadd.f32 %v535_v7, %v534_v3  ;;  %v552_v31 = vadd.f32 %v551_v35, %v550_v56 }
 0x278   :  { %v501_v0 = vadd.f32 %v500_v43, %v499_v63 }
 0x279   :  { %v537_v47 = vrot.slane %v536_v42, 1  ;;  %v590_v49 = vrot.slane %v589_v24, 2  ;;  %v553_v50 = vrot.slane %v552_v31, 4 }
 0x27a   :  { %v502_v14 = vrot.slane %v501_v0, 1 }
 0x27b   :  { %v538_v48 = vadd.f32 %v537_v47, %v536_v42  ;;  %v591_v52 = vadd.f32 %v590_v49, %v589_v24  ;;  %v554_v53 = vadd.f32 %v553_v50, %v552_v31 }
 0x27c   :  { %v503_v26 = vadd.f32 %v502_v14, %v501_v0 }
 0x27d   :  { %651 = vperm.xlu0 %753, %v538_v48   ;;  %v592_v54 = vrot.slane %v591_v52, 1  ;;  %v555_v46 = vrot.slane %v554_v53, 2 }
 0x27e   :  { %637 = vperm.xlu1 %759, %v503_v26  }
 0x27f   :  { %v593_v55 = vadd.f32 %v592_v54, %v591_v52  ;;  %v556_v2 = vadd.f32 %v555_v46, %v554_v53 }
 0x281   :  { %658 = vperm.xlu0 %753, %v593_v55   ;;  %v557_v15 = vrot.slane %v556_v2, 1 }
 0x283   :  { %v558_v60 = vadd.f32 %v557_v15, %v556_v2 }
 0x285   :  { %644 = vperm.xlu1 %759, %v558_v60  }
 0x289   :  { %675 = vperm.xlu1 %759, %v726_v39  }
 0x2e6   :  { %v607_v13 = vpop.permute.xlu1 %606 }
 0x2e7   :  { %v621_v51 = vmul.f32 %v1114_v29, %v607_v13 }
 0x2ea   :  { %v612_v62 = vpop.permute.xlu1 %611 }
 0x2eb   :  { %v622_v37 = vmul.f32 %v1183_v12, %v612_v62 }
 0x2ef   :  { %v756_v16 = vpop.permute.xlu0 %755 }
 0x2f0   :  { %v758_v5 = vunpack.i.h.bf16 %v756_v16  ;;  %v757_v20 = vunpack.i.l.bf16 %v756_v16 }
 0x2f2   :  { %v620_v57 = vmul.f32 %v758_v5, %v1147_v32  ;;  %v619_v19 = vmul.f32 %v757_v20, %v1049_v6 }
 0x2f3   :  { %v617_v59 = vpop.permute.xlu0 %616 }
 0x2f4   :  { %v624_v25 = vadd.f32 %v620_v57, %v619_v19  ;;  %v623_v9 = vmul.f32 %v1086_v44, %v617_v59 }
 0x2f6   :  { %v625_v41 = vadd.f32 %v624_v25, %v621_v51 }
 0x2f8   :  { %v626_v61 = vadd.f32 %v625_v41, %v622_v37 }
 0x2fa   :  { %v627_v58 = vadd.f32 %v626_v61, %v623_v9 }
 0x2fc   :  { %v628_v4 = vrot.slane %v627_v58, 4  ;;  %v652_v8 = vpop.permute.xlu0 %651 }
 0x2fd   :  { %v654_v40 = vsub.f32 %v981_v27, %v652_v8  ;;  %v667_v32 = vsub.f32 %v986_v28, %v652_v8  ;;  %680 = vst [vmem:[%s1407_s6 + $0x2] sm:$0x1] %v652_v8  ;;  %v638_v6 = vpop.permute.xlu1 %637 }
 0x2fe   :  { %v629_v29 = vadd.f32 %v628_v4, %v627_v58  ;;  %v640_v33 = vsub.f32 %v964_v22, %v638_v6  ;;  %v663_v12 = vsub.f32 %v969_v23, %v638_v6  ;;  %679 = vst [vmem:[%s1407_s6 + $0x1] sm:$0x1] %v638_v6 }
 0x2ff   :  { %v655_v44 = vmax.f32 %v654_v40, 0.0  ;;  %v668_v34 = vmax.f32 %v667_v32, 0.0 }
 0x300   :  { %v659_v36 = vpop.permute.xlu0 %658  ;;  %v630_v27 = vrot.slane %v629_v29, 2  ;;  %v641_v1 = vmax.f32 %v640_v33, 0.0  ;;  %v664_v17 = vmax.f32 %v663_v12, 0.0 }
 0x301   :  { %v661_v38 = vmin.f32 %v659_v36, %v655_v44  ;;  %v669_v28 = vmin.f32 %v659_v36, %v668_v34  ;;  %682 = vst [vmem:[%s1407_s6 + $0x4] sm:$0x1] %v659_v36 }
 0x302   :  { %v631_v3 = vadd.f32 %v630_v27, %v629_v29 }
 0x303   :  { %662 = vst [vmem:[#allocation5 + $0x1] sm:$0x1] %v661_v38  ;;  %670 = vst [vmem:[#allocation5 + $0x3] sm:$0x1] %v669_v28 }
 0x304   :  { %v632_v22 = vrot.slane %v631_v3, 1  ;;  %v645_v23 = vpop.permute.xlu1 %644 }
 0x305   :  { %v647_v10 = vmin.f32 %v645_v23, %v641_v1  ;;  %v665_v11 = vmin.f32 %v645_v23, %v664_v17  ;;  %681 = vst [vmem:[%s1407_s6 + $0x3] sm:$0x1] %v645_v23 }
 0x306   :  { %v633_v18 = vadd.f32 %v632_v22, %v631_v3 }
 0x307   :  { %648 = vst [vmem:[#allocation5] sm:$0x1] %v647_v10  ;;  %666 = vst [vmem:[#allocation5 + $0x2] sm:$0x1] %v665_v11 }
 0x308   :  { %634 = vst [vmem:[#allocation3] sm:$0x1] %v633_v18  ;;  %v676_v63 = vpop.permute.xlu1 %675 }
 0x309   :  { %781 = shalt.err (!%p778_p4)
}
 0x30a   :  { %s782_s13 = scalar_lea.hbm %s1405_s4, 16 }
 0x30b   :  { %p783_p5 = scmp.ne.s32.totalorder %s1405_s4, %s782_s13  ;;  %p786_p6 = scmp.lt.u32.totalorder %s782_s13, %s1405_s4 }
 0x30d   :  { %p788_p7 = pnand %p786_p6, %p783_p5 }
 0x30f   :  { %791 = shalt.err (!%p788_p7)
}
 0x310   :  { %693 = dma.vmem_to_hbm [thread:$0]  %s691_s29, 16, %s1405_s4, [#allocation4]   ;;  %678 = vst [vmem:[%s1407_s6] sm:$0x1] %v676_v63 }
 0x311   :  { %s792_s20 = scalar_lea.vmem %s1367_s7, 128  ;;  %p797_p9 = scmp.lt.s32.totalorder %s1367_s7, %s1367_s7 }
 0x312   :  { %p793_p8 = scmp.ne.s32.totalorder %s1367_s7, %s792_s20  ;;  %p798_p10 = scmp.lt.s32.totalorder %s792_s20, %s792_s20 }
 0x314   :  { %p799_p11 = por %p798_p10, %p797_p9 }
 0x316   :  { %p800_p12 = pnand %p799_p11, %p793_p8 }
 0x318   :  { %803 = shalt.err (!%p800_p12)
}
 0x319   :  { %s804_s3 = scalar_lea.hbm %s1406_s5, 128 }
 0x31a   :  { %p805_p13 = scmp.ne.s32.totalorder %s1406_s5, %s804_s3  ;;  %p808_p0 = scmp.lt.u32.totalorder %s804_s3, %s1406_s5 }
 0x31c   :  { %p810_p1 = pnand %p808_p0, %p805_p13 }
 0x31e   :  { %813 = shalt.err (!%p810_p1)
}
 0x31f   :  { %703 = dma.vmem_to_hbm [thread:$0]  %s1367_s7, 128, %s1406_s5, [#allocation6]  }
 0x320   :  { %814 = dma.done.wait [#allocation4], 16  }
 0x321   :  { %815 = vsyncadd [#allocation4], 4294967280 }
 0x322   :  { %816 = dma.done.wait [#allocation6], 128  }
 0x323   :  { %817 = vsyncadd [#allocation6], 4294967168 }
 0x324   :  { %714 = vsyncpa [#allocation4], 1 }
 0x325   :  { %715 = vsyncpa [#allocation6], 1 }

</bundles_post_ra>
